<compile_context>
chip_gen: v7x
topology: tpu7x:2x2x1
jax: 0.10.0
libtpu: 0.0.40
codegen_flags: <defaults>
</compile_context>

<pallas_src>
import functools

import jax
import jax.numpy as jnp
from jax.experimental import pallas as pl
from jax.experimental.pallas import tpu as pltpu

NUM_OF_FEATURES = 5
NUM_OF_LANES = 12
INPUT_DIM = NUM_OF_LANES * NUM_OF_FEATURES   # 60
LSTM_UNITS = 64                              # logical hidden size H
FC_DIMS = (200, 8)

# Lane-padded ("physical") sizes used inside the kernel.
HP = 128          # per-gate hidden width, padded 64 -> 128 (one full vreg lane group)
GP = 4 * HP       # 512: gates i, f, g, o each occupy a 128-lane-aligned block
F1P = 256         # fc1 width 200 -> 256
F2P = 128         # fc2 width 8   -> 128


def _round_up(n, m):
    return (n + m - 1) // m * m


def lstm_critic_kernel(x_ref, wih_ref, whh_ref, b_ref,
                       w1_ref, b1_ref, w2_ref, b2_ref, wh_ref, bh_ref,
                       v_ref, hn_ref, cn_ref, gx_ref):
    """One batch-block of the whole forward pass.

    x_ref   : (T, BB, D)   time-major input block
    wih_ref : (D, GP)      input->gates; gate k lives in lanes [k*HP, k*HP+64), rest 0
    whh_ref : (HP, GP)     hidden->gates; rows 64:128 and padded gate lanes are 0
    b_ref   : (1, GP)      combined bias (b_ih + b_hh); padded lanes 0
    w1_ref  : (HP, F1P), b1_ref : (1, F1P)   fc1 (ReLU)
    w2_ref  : (F1P, F2P), b2_ref: (1, F2P)   fc2 (ReLU)
    wh_ref  : (1, F2P)     critic-head weight as a lane row (VPU head)
    bh_ref  : (1, 1)       critic-head bias
    v_ref   : (BB, 128)    state value broadcast across lanes (lane 0 is the value)
    hn_ref  : (BB, HP)     final h (lanes 64:128 are exactly zero)
    cn_ref  : (BB, HP)     final c (lanes 64:128 are exactly zero)
    gx_ref  : (T, BB, GP)  VMEM scratch: precomputed input projection + bias
    """
    T, BB, _ = x_ref.shape

    wih = wih_ref[...]
    b_full = jnp.broadcast_to(b_ref[...], (BB, GP))   # one broadcast, hoisted

    # ---- Phase 1: input projection for the whole sequence (+ bias fold). ----
    # No dependency on h/c, so this sits off the serial recurrence critical path.
    for t in range(T):
        gx_ref[t] = (
            jnp.dot(x_ref[t], wih, preferred_element_type=jnp.float32) + b_full)

    whh = whh_ref[...]
    h = jnp.zeros((BB, HP), jnp.float32)
    c = jnp.zeros((BB, HP), jnp.float32)

    # ---- Phase 2: serial recurrence. Per step: one MXU matmul + EUP/VPU gates. ----
    # Gate slices are 128-lane aligned (whole vregs) -> no XLU lane selects here.
    # T is a small static int, so the chain is fully unrolled.
    # TODO(synk): for long sequences switch to lax.fori_loop over gx_ref[t] with
    # (h, c) carried, to bound live ranges / avoid spills.
    for t in range(T):
        gates = gx_ref[t] + jnp.dot(h, whh, preferred_element_type=jnp.float32)
        i_g = jax.nn.sigmoid(gates[:, 0 * HP:1 * HP])   # PyTorch gate order i,f,g,o
        f_g = jax.nn.sigmoid(gates[:, 1 * HP:2 * HP])
        g_g = jnp.tanh(gates[:, 2 * HP:3 * HP])
        o_g = jax.nn.sigmoid(gates[:, 3 * HP:4 * HP])
        c = f_g * c + i_g * g_g
        h = o_g * jnp.tanh(c)
    # Padded lanes 64:128 of h and c remain exactly 0 (zero weights/bias + zero init).

    # ---- Phase 3: FC stack (lane-padded MXU matmuls) + critic head on VPU/XLU. ----
    h1 = jnp.maximum(
        jnp.dot(h, w1_ref[...], preferred_element_type=jnp.float32) + b1_ref[...], 0.0)
    h2 = jnp.maximum(
        jnp.dot(h1, w2_ref[...], preferred_element_type=jnp.float32) + b2_ref[...], 0.0)
    # 8 -> 1 head: VPU multiply + lane reduction (a 1-lane MXU matmul would be ~all
    # padding plus result-FIFO drain latency).
    v = jnp.sum(h2 * wh_ref[...], axis=-1, keepdims=True) + bh_ref[...]

    v_ref[...] = jnp.broadcast_to(v, v_ref.shape)   # lane-dense (unmasked) store
    hn_ref[...] = h
    cn_ref[...] = c


@functools.partial(jax.jit, static_argnames=("block_b",))
def lstm_critic_forward(x, packed, block_b=256):
    """x: (B, T, D) batch_first, like the PyTorch module.

    Returns (state_value (B,1), (h_n (1,B,H), c_n (1,B,H))) with zero initial state
    (the hidden_state=None path of the PyTorch module).
    """
    B, T, D = x.shape
    H = LSTM_UNITS

    # Rows per grid step: multiple of 8 sublanes, never more than the padded batch.
    bb = min(_round_up(block_b, 8), _round_up(B, 8))
    Bp = _round_up(B, bb)                # padded batch
    grid = (Bp // bb,)

    # Time-major + batch padding: per-step reads inside the kernel become clean
    # contiguous (BB, D) tiles, and batch blocks shard across TensorCores.
    x_tm = jnp.transpose(x, (1, 0, 2))           # (T, B, D)
    if Bp != B:
        x_tm = jnp.pad(x_tm, ((0, 0), (0, Bp - B), (0, 0)))

    const = lambda i: (0, 0)   # weights stay resident across the batch grid
    in_specs = [
        pl.BlockSpec((T, bb, D), lambda i: (0, i, 0)),   # x (time-major)
        pl.BlockSpec((D, GP), const),                    # wih
        pl.BlockSpec((HP, GP), const),                   # whh
        pl.BlockSpec((1, GP), const),                    # b
        pl.BlockSpec((HP, F1P), const),                  # w1
        pl.BlockSpec((1, F1P), const),                   # b1
        pl.BlockSpec((F1P, F2P), const),                 # w2
        pl.BlockSpec((1, F2P), const),                   # b2
        pl.BlockSpec((1, F2P), const),                   # wh (row)
        pl.BlockSpec((1, 1), const),                     # bh
    ]
    out_specs = [
        pl.BlockSpec((bb, 128), lambda i: (i, 0)),       # v (lane-broadcast)
        pl.BlockSpec((bb, HP), lambda i: (i, 0)),        # h_n (padded)
        pl.BlockSpec((bb, HP), lambda i: (i, 0)),        # c_n (padded)
    ]

    v_b, h_p, c_p = pl.pallas_call(
        lstm_critic_kernel,
        out_shape=(
            jax.ShapeDtypeStruct((Bp, 128), jnp.float32),
            jax.ShapeDtypeStruct((Bp, HP), jnp.float32),
            jax.ShapeDtypeStruct((Bp, HP), jnp.float32),
        ),
        grid_spec=pltpu.PrefetchScalarGridSpec(
            num_scalar_prefetch=0,
            grid=grid,
            in_specs=in_specs,
            out_specs=out_specs,
            scratch_shapes=[pltpu.VMEM((T, bb, GP), jnp.float32)],
        ),
        compiler_params=pltpu.CompilerParams(
            dimension_semantics=("parallel",)),          # batch blocks across TCs
    )(x_tm, packed["wih"], packed["whh"], packed["b"],
      packed["w1"], packed["b1"], packed["w2"], packed["b2"],
      packed["wh"], packed["bh"])

    v = v_b[:B, :1]
    hn = h_p[:B, :H][None, :, :]
    cn = c_p[:B, :H][None, :, :]
    return v, (hn, cn)


def init_params(key):
    """PyTorch-style uniform(-1/sqrt(fan), 1/sqrt(fan)) init, logical layout
    (weights pre-transposed to (in_features, out_features); biases as (1, out))."""
    D, H = INPUT_DIM, LSTM_UNITS
    ks = jax.random.split(key, 10)
    u = lambda k, shape, bound: jax.random.uniform(
        k, shape, jnp.float32, minval=-bound, maxval=bound)

    kl = 1.0 / jnp.sqrt(H)
    wih = u(ks[0], (D, 4 * H), kl)
    whh = u(ks[1], (H, 4 * H), kl)
    b = u(ks[2], (1, 4 * H), kl) + u(ks[3], (1, 4 * H), kl)   # b_ih + b_hh combined

    k1 = 1.0 / jnp.sqrt(H)
    w1 = u(ks[4], (H, FC_DIMS[0]), k1)
    b1 = u(ks[5], (1, FC_DIMS[0]), k1)
    k2 = 1.0 / jnp.sqrt(FC_DIMS[0])
    w2 = u(ks[6], (FC_DIMS[0], FC_DIMS[1]), k2)
    b2 = u(ks[7], (1, FC_DIMS[1]), k2)
    kh = 1.0 / jnp.sqrt(FC_DIMS[1])
    wh = u(ks[8], (FC_DIMS[1], 1), kh)
    bh = u(ks[9], (1, 1), kh)
    return dict(wih=wih, whh=whh, b=b, w1=w1, b1=b1, w2=w2, b2=b2, wh=wh, bh=bh)


def pack_params(p):
    """Zero-pad logical params to the lane-aligned kernel layout.

    LSTM gate k (order i,f,g,o) moves from lanes [k*64,(k+1)*64) to [k*128,k*128+64)
    so every gate slice in the kernel is a full vreg. All padded rows/lanes are zero,
    which keeps the padded lanes of h/c exactly zero throughout the recurrence.
    """
    H = LSTM_UNITS
    F1, F2 = FC_DIMS

    def pad_gate_cols(w):
        out = jnp.zeros((w.shape[0], GP), jnp.float32)
        for k in range(4):
            out = out.at[:, k * HP:k * HP + H].set(w[:, k * H:(k + 1) * H])
        return out

    wih_p = pad_gate_cols(p["wih"])                                          # (D, GP)
    whh_p = jnp.zeros((HP, GP), jnp.float32).at[:H].set(pad_gate_cols(p["whh"]))
    b_p = pad_gate_cols(p["b"])                                              # (1, GP)
    w1_p = jnp.zeros((HP, F1P), jnp.float32).at[:H, :F1].set(p["w1"])
    b1_p = jnp.zeros((1, F1P), jnp.float32).at[:, :F1].set(p["b1"])
    w2_p = jnp.zeros((F1P, F2P), jnp.float32).at[:F1, :F2].set(p["w2"])
    b2_p = jnp.zeros((1, F2P), jnp.float32).at[:, :F2].set(p["b2"])
    wh_p = jnp.zeros((1, F2P), jnp.float32).at[:, :F2].set(p["wh"].reshape(1, F2))
    return dict(wih=wih_p, whh=whh_p, b=b_p, w1=w1_p, b1=b1_p,
                w2=w2_p, b2=b2_p, wh=wh_p, bh=p["bh"])


def reference_forward(x, params):
    """Pure-JAX reference of the same math (logical, unpadded params)."""
    B, T, D = x.shape
    H = LSTM_UNITS
    h = jnp.zeros((B, H), jnp.float32)
    c = jnp.zeros((B, H), jnp.float32)
    for t in range(T):
        gates = x[:, t, :] @ params["wih"] + h @ params["whh"] + params["b"]
        i_g = jax.nn.sigmoid(gates[:, 0 * H:1 * H])
        f_g = jax.nn.sigmoid(gates[:, 1 * H:2 * H])
        g_g = jnp.tanh(gates[:, 2 * H:3 * H])
        o_g = jax.nn.sigmoid(gates[:, 3 * H:4 * H])
        c = f_g * c + i_g * g_g
        h = o_g * jnp.tanh(c)
    h1 = jnp.maximum(h @ params["w1"] + params["b1"], 0.0)
    h2 = jnp.maximum(h1 @ params["w2"] + params["b2"], 0.0)
    v = h2 @ params["wh"] + params["bh"]
    return v, (h[None], c[None])


def _check_case(params, packed, key, B, T):
    x = jax.random.normal(key, (B, T, INPUT_DIM), jnp.float32)
    v, (hn, cn) = lstm_critic_forward(x, packed)
    jax.block_until_ready((v, hn, cn))

    v_ref, (hn_ref, cn_ref) = reference_forward(x, params)
    assert v.shape == (B, 1)
    assert hn.shape == (1, B, LSTM_UNITS) and cn.shape == (1, B, LSTM_UNITS)
    assert jnp.allclose(v, v_ref, atol=1e-4, rtol=1e-4)
    assert jnp.allclose(hn, hn_ref, atol=1e-4, rtol=1e-4)
    assert jnp.allclose(cn, cn_ref, atol=1e-4, rtol=1e-4)


if __name__ == "__main__":
    key = jax.random.PRNGKey(0)
    pkey, xkey1, xkey2 = jax.random.split(key, 3)
    params = init_params(pkey)
    packed = pack_params(params)

    _check_case(params, packed, xkey1, B=2, T=8)    # small, same as module default use
    _check_case(params, packed, xkey2, B=10, T=6)   # exercises batch padding path

    print("KERNEL_OK")
</pallas_src>

<mosaic_0001>
module attributes {stable_mosaic.version = 11 : i64} {
  func.func @lstm_critic_kernel(%arg0: i32, %arg1: memref<8x8x60xf32, #tpu.memory_space<vmem>>, %arg2: memref<60x512xf32, #tpu.memory_space<vmem>>, %arg3: memref<128x512xf32, #tpu.memory_space<vmem>>, %arg4: memref<1x512xf32, #tpu.memory_space<vmem>>, %arg5: memref<128x256xf32, #tpu.memory_space<vmem>>, %arg6: memref<1x256xf32, #tpu.memory_space<vmem>>, %arg7: memref<256x128xf32, #tpu.memory_space<vmem>>, %arg8: memref<1x128xf32, #tpu.memory_space<vmem>>, %arg9: memref<1x128xf32, #tpu.memory_space<vmem>>, %arg10: memref<1x1xf32, #tpu.memory_space<vmem>>, %arg11: memref<8x128xf32, #tpu.memory_space<vmem>>, %arg12: memref<8x128xf32, #tpu.memory_space<vmem>>, %arg13: memref<8x128xf32, #tpu.memory_space<vmem>>, %arg14: memref<8x8x512xf32, #tpu.memory_space<vmem>>) attributes {dimension_semantics = [#tpu.dimension_semantics<parallel>], iteration_bounds = array<i64: 1>, scalar_prefetch = 0 : i64, scratch_operands = 1 : i64, tpu.core_type = #tpu.core_type<tc>, window_params = [{transform_indices = @transform_0, window_bounds = array<i64: 8, 8, 60>}, {pipeline_mode = #tpu.pipeline_mode<synchronous>, transform_indices = @transform_1, window_bounds = array<i64: 60, 512>}, {pipeline_mode = #tpu.pipeline_mode<synchronous>, transform_indices = @transform_2, window_bounds = array<i64: 128, 512>}, {pipeline_mode = #tpu.pipeline_mode<synchronous>, transform_indices = @transform_3, window_bounds = array<i64: 1, 512>}, {pipeline_mode = #tpu.pipeline_mode<synchronous>, transform_indices = @transform_4, window_bounds = array<i64: 128, 256>}, {pipeline_mode = #tpu.pipeline_mode<synchronous>, transform_indices = @transform_5, window_bounds = array<i64: 1, 256>}, {pipeline_mode = #tpu.pipeline_mode<synchronous>, transform_indices = @transform_6, window_bounds = array<i64: 256, 128>}, {pipeline_mode = #tpu.pipeline_mode<synchronous>, transform_indices = @transform_7, window_bounds = array<i64: 1, 128>}, {pipeline_mode = #tpu.pipeline_mode<synchronous>, transform_indices = @transform_8, window_bounds = array<i64: 1, 128>}, {pipeline_mode = #tpu.pipeline_mode<synchronous>, transform_indices = @transform_9, window_bounds = array<i64: 1, 1>}, {transform_indices = @transform_10, window_bounds = array<i64: 8, 128>}, {transform_indices = @transform_11, window_bounds = array<i64: 8, 128>}, {transform_indices = @transform_12, window_bounds = array<i64: 8, 128>}]} {
    %c0 = arith.constant 0 : index
    %c0_0 = arith.constant 0 : index
    %0 = vector.load %arg2[%c0, %c0_0] : memref<60x512xf32, #tpu.memory_space<vmem>>, vector<60x512xf32>
    %c0_1 = arith.constant 0 : index
    %c0_2 = arith.constant 0 : index
    %1 = vector.load %arg4[%c0_1, %c0_2] : memref<1x512xf32, #tpu.memory_space<vmem>>, vector<1x512xf32>
    %2 = vector.shape_cast %1 : vector<1x512xf32> to vector<1x512xf32>
    %3 = vector.broadcast %2 : vector<1x512xf32> to vector<8x512xf32>
    %c0_3 = arith.constant 0 : index
    %c0_4 = arith.constant 0 : index
    %c0_5 = arith.constant 0 : index
    %4 = vector.load %arg1[%c0_3, %c0_4, %c0_5] : memref<8x8x60xf32, #tpu.memory_space<vmem>>, vector<1x8x60xf32>
    %5 = vector.shape_cast %4 : vector<1x8x60xf32> to vector<8x60xf32>
    %cst = arith.constant dense<0.000000e+00> : vector<8x512xf32>
    %6 = tpu.matmul %5, %0, %cst {dimension_numbers = #tpu.dot_dimension_numbers<[1], [0], [0], [1], [0, 0, 1, 1], [], []>} : vector<8x60xf32>, vector<60x512xf32>, vector<8x512xf32> -> vector<8x512xf32>
    %7 = arith.addf %6, %3 : vector<8x512xf32>
    %c0_6 = arith.constant 0 : index
    %c0_7 = arith.constant 0 : index
    %c0_8 = arith.constant 0 : index
    %8 = vector.load %arg14[%c0_6, %c0_7, %c0_8] : memref<8x8x512xf32, #tpu.memory_space<vmem>>, vector<1x8x512xf32>
    %9 = vector.shape_cast %8 : vector<1x8x512xf32> to vector<8x512xf32>
    %10 = vector.shape_cast %7 : vector<8x512xf32> to vector<1x8x512xf32>
    tpu.vector_store %arg14[%c0_6, %c0_7, %c0_8], %10 {strides = array<i32>} : memref<8x8x512xf32, #tpu.memory_space<vmem>>, vector<1x8x512xf32>,
    %c1 = arith.constant 1 : index
    %c0_9 = arith.constant 0 : index
    %c0_10 = arith.constant 0 : index
    %11 = vector.load %arg1[%c1, %c0_9, %c0_10] : memref<8x8x60xf32, #tpu.memory_space<vmem>>, vector<1x8x60xf32>
    %12 = vector.shape_cast %11 : vector<1x8x60xf32> to vector<8x60xf32>
    %cst_11 = arith.constant dense<0.000000e+00> : vector<8x512xf32>
    %13 = tpu.matmul %12, %0, %cst_11 {dimension_numbers = #tpu.dot_dimension_numbers<[1], [0], [0], [1], [0, 0, 1, 1], [], []>} : vector<8x60xf32>, vector<60x512xf32>, vector<8x512xf32> -> vector<8x512xf32>
    %14 = arith.addf %13, %3 : vector<8x512xf32>
    %c1_12 = arith.constant 1 : index
    %c0_13 = arith.constant 0 : index
    %c0_14 = arith.constant 0 : index
    %15 = vector.load %arg14[%c1_12, %c0_13, %c0_14] : memref<8x8x512xf32, #tpu.memory_space<vmem>>, vector<1x8x512xf32>
    %16 = vector.shape_cast %15 : vector<1x8x512xf32> to vector<8x512xf32>
    %17 = vector.shape_cast %14 : vector<8x512xf32> to vector<1x8x512xf32>
    tpu.vector_store %arg14[%c1_12, %c0_13, %c0_14], %17 {strides = array<i32>} : memref<8x8x512xf32, #tpu.memory_space<vmem>>, vector<1x8x512xf32>,
    %c2 = arith.constant 2 : index
    %c0_15 = arith.constant 0 : index
    %c0_16 = arith.constant 0 : index
    %18 = vector.load %arg1[%c2, %c0_15, %c0_16] : memref<8x8x60xf32, #tpu.memory_space<vmem>>, vector<1x8x60xf32>
    %19 = vector.shape_cast %18 : vector<1x8x60xf32> to vector<8x60xf32>
    %cst_17 = arith.constant dense<0.000000e+00> : vector<8x512xf32>
    %20 = tpu.matmul %19, %0, %cst_17 {dimension_numbers = #tpu.dot_dimension_numbers<[1], [0], [0], [1], [0, 0, 1, 1], [], []>} : vector<8x60xf32>, vector<60x512xf32>, vector<8x512xf32> -> vector<8x512xf32>
    %21 = arith.addf %20, %3 : vector<8x512xf32>
    %c2_18 = arith.constant 2 : index
    %c0_19 = arith.constant 0 : index
    %c0_20 = arith.constant 0 : index
    %22 = vector.load %arg14[%c2_18, %c0_19, %c0_20] : memref<8x8x512xf32, #tpu.memory_space<vmem>>, vector<1x8x512xf32>
    %23 = vector.shape_cast %22 : vector<1x8x512xf32> to vector<8x512xf32>
    %24 = vector.shape_cast %21 : vector<8x512xf32> to vector<1x8x512xf32>
    tpu.vector_store %arg14[%c2_18, %c0_19, %c0_20], %24 {strides = array<i32>} : memref<8x8x512xf32, #tpu.memory_space<vmem>>, vector<1x8x512xf32>,
    %c3 = arith.constant 3 : index
    %c0_21 = arith.constant 0 : index
    %c0_22 = arith.constant 0 : index
    %25 = vector.load %arg1[%c3, %c0_21, %c0_22] : memref<8x8x60xf32, #tpu.memory_space<vmem>>, vector<1x8x60xf32>
    %26 = vector.shape_cast %25 : vector<1x8x60xf32> to vector<8x60xf32>
    %cst_23 = arith.constant dense<0.000000e+00> : vector<8x512xf32>
    %27 = tpu.matmul %26, %0, %cst_23 {dimension_numbers = #tpu.dot_dimension_numbers<[1], [0], [0], [1], [0, 0, 1, 1], [], []>} : vector<8x60xf32>, vector<60x512xf32>, vector<8x512xf32> -> vector<8x512xf32>
    %28 = arith.addf %27, %3 : vector<8x512xf32>
    %c3_24 = arith.constant 3 : index
    %c0_25 = arith.constant 0 : index
    %c0_26 = arith.constant 0 : index
    %29 = vector.load %arg14[%c3_24, %c0_25, %c0_26] : memref<8x8x512xf32, #tpu.memory_space<vmem>>, vector<1x8x512xf32>
    %30 = vector.shape_cast %29 : vector<1x8x512xf32> to vector<8x512xf32>
    %31 = vector.shape_cast %28 : vector<8x512xf32> to vector<1x8x512xf32>
    tpu.vector_store %arg14[%c3_24, %c0_25, %c0_26], %31 {strides = array<i32>} : memref<8x8x512xf32, #tpu.memory_space<vmem>>, vector<1x8x512xf32>,
    %c4 = arith.constant 4 : index
    %c0_27 = arith.constant 0 : index
    %c0_28 = arith.constant 0 : index
    %32 = vector.load %arg1[%c4, %c0_27, %c0_28] : memref<8x8x60xf32, #tpu.memory_space<vmem>>, vector<1x8x60xf32>
    %33 = vector.shape_cast %32 : vector<1x8x60xf32> to vector<8x60xf32>
    %cst_29 = arith.constant dense<0.000000e+00> : vector<8x512xf32>
    %34 = tpu.matmul %33, %0, %cst_29 {dimension_numbers = #tpu.dot_dimension_numbers<[1], [0], [0], [1], [0, 0, 1, 1], [], []>} : vector<8x60xf32>, vector<60x512xf32>, vector<8x512xf32> -> vector<8x512xf32>
    %35 = arith.addf %34, %3 : vector<8x512xf32>
    %c4_30 = arith.constant 4 : index
    %c0_31 = arith.constant 0 : index
    %c0_32 = arith.constant 0 : index
    %36 = vector.load %arg14[%c4_30, %c0_31, %c0_32] : memref<8x8x512xf32, #tpu.memory_space<vmem>>, vector<1x8x512xf32>
    %37 = vector.shape_cast %36 : vector<1x8x512xf32> to vector<8x512xf32>
    %38 = vector.shape_cast %35 : vector<8x512xf32> to vector<1x8x512xf32>
    tpu.vector_store %arg14[%c4_30, %c0_31, %c0_32], %38 {strides = array<i32>} : memref<8x8x512xf32, #tpu.memory_space<vmem>>, vector<1x8x512xf32>,
    %c5 = arith.constant 5 : index
    %c0_33 = arith.constant 0 : index
    %c0_34 = arith.constant 0 : index
    %39 = vector.load %arg1[%c5, %c0_33, %c0_34] : memref<8x8x60xf32, #tpu.memory_space<vmem>>, vector<1x8x60xf32>
    %40 = vector.shape_cast %39 : vector<1x8x60xf32> to vector<8x60xf32>
    %cst_35 = arith.constant dense<0.000000e+00> : vector<8x512xf32>
    %41 = tpu.matmul %40, %0, %cst_35 {dimension_numbers = #tpu.dot_dimension_numbers<[1], [0], [0], [1], [0, 0, 1, 1], [], []>} : vector<8x60xf32>, vector<60x512xf32>, vector<8x512xf32> -> vector<8x512xf32>
    %42 = arith.addf %41, %3 : vector<8x512xf32>
    %c5_36 = arith.constant 5 : index
    %c0_37 = arith.constant 0 : index
    %c0_38 = arith.constant 0 : index
    %43 = vector.load %arg14[%c5_36, %c0_37, %c0_38] : memref<8x8x512xf32, #tpu.memory_space<vmem>>, vector<1x8x512xf32>
    %44 = vector.shape_cast %43 : vector<1x8x512xf32> to vector<8x512xf32>
    %45 = vector.shape_cast %42 : vector<8x512xf32> to vector<1x8x512xf32>
    tpu.vector_store %arg14[%c5_36, %c0_37, %c0_38], %45 {strides = array<i32>} : memref<8x8x512xf32, #tpu.memory_space<vmem>>, vector<1x8x512xf32>,
    %c6 = arith.constant 6 : index
    %c0_39 = arith.constant 0 : index
    %c0_40 = arith.constant 0 : index
    %46 = vector.load %arg1[%c6, %c0_39, %c0_40] : memref<8x8x60xf32, #tpu.memory_space<vmem>>, vector<1x8x60xf32>
    %47 = vector.shape_cast %46 : vector<1x8x60xf32> to vector<8x60xf32>
    %cst_41 = arith.constant dense<0.000000e+00> : vector<8x512xf32>
    %48 = tpu.matmul %47, %0, %cst_41 {dimension_numbers = #tpu.dot_dimension_numbers<[1], [0], [0], [1], [0, 0, 1, 1], [], []>} : vector<8x60xf32>, vector<60x512xf32>, vector<8x512xf32> -> vector<8x512xf32>
    %49 = arith.addf %48, %3 : vector<8x512xf32>
    %c6_42 = arith.constant 6 : index
    %c0_43 = arith.constant 0 : index
    %c0_44 = arith.constant 0 : index
    %50 = vector.load %arg14[%c6_42, %c0_43, %c0_44] : memref<8x8x512xf32, #tpu.memory_space<vmem>>, vector<1x8x512xf32>
    %51 = vector.shape_cast %50 : vector<1x8x512xf32> to vector<8x512xf32>
    %52 = vector.shape_cast %49 : vector<8x512xf32> to vector<1x8x512xf32>
    tpu.vector_store %arg14[%c6_42, %c0_43, %c0_44], %52 {strides = array<i32>} : memref<8x8x512xf32, #tpu.memory_space<vmem>>, vector<1x8x512xf32>,
    %c7 = arith.constant 7 : index
    %c0_45 = arith.constant 0 : index
    %c0_46 = arith.constant 0 : index
    %53 = vector.load %arg1[%c7, %c0_45, %c0_46] : memref<8x8x60xf32, #tpu.memory_space<vmem>>, vector<1x8x60xf32>
    %54 = vector.shape_cast %53 : vector<1x8x60xf32> to vector<8x60xf32>
    %cst_47 = arith.constant dense<0.000000e+00> : vector<8x512xf32>
    %55 = tpu.matmul %54, %0, %cst_47 {dimension_numbers = #tpu.dot_dimension_numbers<[1], [0], [0], [1], [0, 0, 1, 1], [], []>} : vector<8x60xf32>, vector<60x512xf32>, vector<8x512xf32> -> vector<8x512xf32>
    %56 = arith.addf %55, %3 : vector<8x512xf32>
    %c7_48 = arith.constant 7 : index
    %c0_49 = arith.constant 0 : index
    %c0_50 = arith.constant 0 : index
    %57 = vector.load %arg14[%c7_48, %c0_49, %c0_50] : memref<8x8x512xf32, #tpu.memory_space<vmem>>, vector<1x8x512xf32>
    %58 = vector.shape_cast %57 : vector<1x8x512xf32> to vector<8x512xf32>
    %59 = vector.shape_cast %56 : vector<8x512xf32> to vector<1x8x512xf32>
    tpu.vector_store %arg14[%c7_48, %c0_49, %c0_50], %59 {strides = array<i32>} : memref<8x8x512xf32, #tpu.memory_space<vmem>>, vector<1x8x512xf32>,
    %c0_51 = arith.constant 0 : index
    %c0_52 = arith.constant 0 : index
    %60 = vector.load %arg3[%c0_51, %c0_52] : memref<128x512xf32, #tpu.memory_space<vmem>>, vector<128x512xf32>
    %cst_53 = arith.constant 0.000000e+00 : f32
    %61 = vector.broadcast %cst_53 : f32 to vector<8x128xf32>
    %cst_54 = arith.constant 0.000000e+00 : f32
    %62 = vector.broadcast %cst_54 : f32 to vector<8x128xf32>
    %c0_55 = arith.constant 0 : index
    %c0_56 = arith.constant 0 : index
    %c0_57 = arith.constant 0 : index
    %63 = vector.load %arg14[%c0_55, %c0_56, %c0_57] : memref<8x8x512xf32, #tpu.memory_space<vmem>>, vector<1x8x512xf32>
    %64 = vector.shape_cast %63 : vector<1x8x512xf32> to vector<8x512xf32>
    %cst_58 = arith.constant dense<0.000000e+00> : vector<8x512xf32>
    %65 = tpu.matmul %61, %60, %cst_58 {dimension_numbers = #tpu.dot_dimension_numbers<[1], [0], [0], [1], [0, 0, 1, 1], [], []>} : vector<8x128xf32>, vector<128x512xf32>, vector<8x512xf32> -> vector<8x512xf32>
    %66 = arith.addf %64, %65 : vector<8x512xf32>
    %67 = vector.extract_strided_slice %66 {offsets = [0, 0], sizes = [8, 128], strides = [1, 1]} : vector<8x512xf32> to vector<8x128xf32>
    %68 = arith.negf %67 : vector<8x128xf32>
    %69 = math.exp %68 : vector<8x128xf32>
    %cst_59 = arith.constant 1.000000e+00 : f32
    %70 = vector.broadcast %cst_59 : f32 to vector<8x128xf32>
    %71 = arith.addf %70, %69 : vector<8x128xf32>
    %72 = arith.divf %70, %71 : vector<8x128xf32>
    %73 = vector.extract_strided_slice %66 {offsets = [0, 128], sizes = [8, 128], strides = [1, 1]} : vector<8x512xf32> to vector<8x128xf32>
    %74 = arith.negf %73 : vector<8x128xf32>
    %75 = math.exp %74 : vector<8x128xf32>
    %cst_60 = arith.constant 1.000000e+00 : f32
    %76 = vector.broadcast %cst_60 : f32 to vector<8x128xf32>
    %77 = arith.addf %76, %75 : vector<8x128xf32>
    %78 = arith.divf %76, %77 : vector<8x128xf32>
    %79 = vector.extract_strided_slice %66 {offsets = [0, 256], sizes = [8, 128], strides = [1, 1]} : vector<8x512xf32> to vector<8x128xf32>
    %80 = math.tanh %79 : vector<8x128xf32>
    %81 = vector.extract_strided_slice %66 {offsets = [0, 384], sizes = [8, 128], strides = [1, 1]} : vector<8x512xf32> to vector<8x128xf32>
    %82 = arith.negf %81 : vector<8x128xf32>
    %83 = math.exp %82 : vector<8x128xf32>
    %cst_61 = arith.constant 1.000000e+00 : f32
    %84 = vector.broadcast %cst_61 : f32 to vector<8x128xf32>
    %85 = arith.addf %84, %83 : vector<8x128xf32>
    %86 = arith.divf %84, %85 : vector<8x128xf32>
    %87 = arith.mulf %78, %62 : vector<8x128xf32>
    %88 = arith.mulf %72, %80 : vector<8x128xf32>
    %89 = arith.addf %87, %88 : vector<8x128xf32>
    %90 = math.tanh %89 : vector<8x128xf32>
    %91 = arith.mulf %86, %90 : vector<8x128xf32>
    %c1_62 = arith.constant 1 : index
    %c0_63 = arith.constant 0 : index
    %c0_64 = arith.constant 0 : index
    %92 = vector.load %arg14[%c1_62, %c0_63, %c0_64] : memref<8x8x512xf32, #tpu.memory_space<vmem>>, vector<1x8x512xf32>
    %93 = vector.shape_cast %92 : vector<1x8x512xf32> to vector<8x512xf32>
    %cst_65 = arith.constant dense<0.000000e+00> : vector<8x512xf32>
    %94 = tpu.matmul %91, %60, %cst_65 {dimension_numbers = #tpu.dot_dimension_numbers<[1], [0], [0], [1], [0, 0, 1, 1], [], []>} : vector<8x128xf32>, vector<128x512xf32>, vector<8x512xf32> -> vector<8x512xf32>
    %95 = arith.addf %93, %94 : vector<8x512xf32>
    %96 = vector.extract_strided_slice %95 {offsets = [0, 0], sizes = [8, 128], strides = [1, 1]} : vector<8x512xf32> to vector<8x128xf32>
    %97 = arith.negf %96 : vector<8x128xf32>
    %98 = math.exp %97 : vector<8x128xf32>
    %cst_66 = arith.constant 1.000000e+00 : f32
    %99 = vector.broadcast %cst_66 : f32 to vector<8x128xf32>
    %100 = arith.addf %99, %98 : vector<8x128xf32>
    %101 = arith.divf %99, %100 : vector<8x128xf32>
    %102 = vector.extract_strided_slice %95 {offsets = [0, 128], sizes = [8, 128], strides = [1, 1]} : vector<8x512xf32> to vector<8x128xf32>
    %103 = arith.negf %102 : vector<8x128xf32>
    %104 = math.exp %103 : vector<8x128xf32>
    %cst_67 = arith.constant 1.000000e+00 : f32
    %105 = vector.broadcast %cst_67 : f32 to vector<8x128xf32>
    %106 = arith.addf %105, %104 : vector<8x128xf32>
    %107 = arith.divf %105, %106 : vector<8x128xf32>
    %108 = vector.extract_strided_slice %95 {offsets = [0, 256], sizes = [8, 128], strides = [1, 1]} : vector<8x512xf32> to vector<8x128xf32>
    %109 = math.tanh %108 : vector<8x128xf32>
    %110 = vector.extract_strided_slice %95 {offsets = [0, 384], sizes = [8, 128], strides = [1, 1]} : vector<8x512xf32> to vector<8x128xf32>
    %111 = arith.negf %110 : vector<8x128xf32>
    %112 = math.exp %111 : vector<8x128xf32>
    %cst_68 = arith.constant 1.000000e+00 : f32
    %113 = vector.broadcast %cst_68 : f32 to vector<8x128xf32>
    %114 = arith.addf %113, %112 : vector<8x128xf32>
    %115 = arith.divf %113, %114 : vector<8x128xf32>
    %116 = arith.mulf %107, %89 : vector<8x128xf32>
    %117 = arith.mulf %101, %109 : vector<8x128xf32>
    %118 = arith.addf %116, %117 : vector<8x128xf32>
    %119 = math.tanh %118 : vector<8x128xf32>
    %120 = arith.mulf %115, %119 : vector<8x128xf32>
    %c2_69 = arith.constant 2 : index
    %c0_70 = arith.constant 0 : index
    %c0_71 = arith.constant 0 : index
    %121 = vector.load %arg14[%c2_69, %c0_70, %c0_71] : memref<8x8x512xf32, #tpu.memory_space<vmem>>, vector<1x8x512xf32>
    %122 = vector.shape_cast %121 : vector<1x8x512xf32> to vector<8x512xf32>
    %cst_72 = arith.constant dense<0.000000e+00> : vector<8x512xf32>
    %123 = tpu.matmul %120, %60, %cst_72 {dimension_numbers = #tpu.dot_dimension_numbers<[1], [0], [0], [1], [0, 0, 1, 1], [], []>} : vector<8x128xf32>, vector<128x512xf32>, vector<8x512xf32> -> vector<8x512xf32>
    %124 = arith.addf %122, %123 : vector<8x512xf32>
    %125 = vector.extract_strided_slice %124 {offsets = [0, 0], sizes = [8, 128], strides = [1, 1]} : vector<8x512xf32> to vector<8x128xf32>
    %126 = arith.negf %125 : vector<8x128xf32>
    %127 = math.exp %126 : vector<8x128xf32>
    %cst_73 = arith.constant 1.000000e+00 : f32
    %128 = vector.broadcast %cst_73 : f32 to vector<8x128xf32>
    %129 = arith.addf %128, %127 : vector<8x128xf32>
    %130 = arith.divf %128, %129 : vector<8x128xf32>
    %131 = vector.extract_strided_slice %124 {offsets = [0, 128], sizes = [8, 128], strides = [1, 1]} : vector<8x512xf32> to vector<8x128xf32>
    %132 = arith.negf %131 : vector<8x128xf32>
    %133 = math.exp %132 : vector<8x128xf32>
    %cst_74 = arith.constant 1.000000e+00 : f32
    %134 = vector.broadcast %cst_74 : f32 to vector<8x128xf32>
    %135 = arith.addf %134, %133 : vector<8x128xf32>
    %136 = arith.divf %134, %135 : vector<8x128xf32>
    %137 = vector.extract_strided_slice %124 {offsets = [0, 256], sizes = [8, 128], strides = [1, 1]} : vector<8x512xf32> to vector<8x128xf32>
    %138 = math.tanh %137 : vector<8x128xf32>
    %139 = vector.extract_strided_slice %124 {offsets = [0, 384], sizes = [8, 128], strides = [1, 1]} : vector<8x512xf32> to vector<8x128xf32>
    %140 = arith.negf %139 : vector<8x128xf32>
    %141 = math.exp %140 : vector<8x128xf32>
    %cst_75 = arith.constant 1.000000e+00 : f32
    %142 = vector.broadcast %cst_75 : f32 to vector<8x128xf32>
    %143 = arith.addf %142, %141 : vector<8x128xf32>
    %144 = arith.divf %142, %143 : vector<8x128xf32>
    %145 = arith.mulf %136, %118 : vector<8x128xf32>
    %146 = arith.mulf %130, %138 : vector<8x128xf32>
    %147 = arith.addf %145, %146 : vector<8x128xf32>
    %148 = math.tanh %147 : vector<8x128xf32>
    %149 = arith.mulf %144, %148 : vector<8x128xf32>
    %c3_76 = arith.constant 3 : index
    %c0_77 = arith.constant 0 : index
    %c0_78 = arith.constant 0 : index
    %150 = vector.load %arg14[%c3_76, %c0_77, %c0_78] : memref<8x8x512xf32, #tpu.memory_space<vmem>>, vector<1x8x512xf32>
    %151 = vector.shape_cast %150 : vector<1x8x512xf32> to vector<8x512xf32>
    %cst_79 = arith.constant dense<0.000000e+00> : vector<8x512xf32>
    %152 = tpu.matmul %149, %60, %cst_79 {dimension_numbers = #tpu.dot_dimension_numbers<[1], [0], [0], [1], [0, 0, 1, 1], [], []>} : vector<8x128xf32>, vector<128x512xf32>, vector<8x512xf32> -> vector<8x512xf32>
    %153 = arith.addf %151, %152 : vector<8x512xf32>
    %154 = vector.extract_strided_slice %153 {offsets = [0, 0], sizes = [8, 128], strides = [1, 1]} : vector<8x512xf32> to vector<8x128xf32>
    %155 = arith.negf %154 : vector<8x128xf32>
    %156 = math.exp %155 : vector<8x128xf32>
    %cst_80 = arith.constant 1.000000e+00 : f32
    %157 = vector.broadcast %cst_80 : f32 to vector<8x128xf32>
    %158 = arith.addf %157, %156 : vector<8x128xf32>
    %159 = arith.divf %157, %158 : vector<8x128xf32>
    %160 = vector.extract_strided_slice %153 {offsets = [0, 128], sizes = [8, 128], strides = [1, 1]} : vector<8x512xf32> to vector<8x128xf32>
    %161 = arith.negf %160 : vector<8x128xf32>
    %162 = math.exp %161 : vector<8x128xf32>
    %cst_81 = arith.constant 1.000000e+00 : f32
    %163 = vector.broadcast %cst_81 : f32 to vector<8x128xf32>
    %164 = arith.addf %163, %162 : vector<8x128xf32>
    %165 = arith.divf %163, %164 : vector<8x128xf32>
    %166 = vector.extract_strided_slice %153 {offsets = [0, 256], sizes = [8, 128], strides = [1, 1]} : vector<8x512xf32> to vector<8x128xf32>
    %167 = math.tanh %166 : vector<8x128xf32>
    %168 = vector.extract_strided_slice %153 {offsets = [0, 384], sizes = [8, 128], strides = [1, 1]} : vector<8x512xf32> to vector<8x128xf32>
    %169 = arith.negf %168 : vector<8x128xf32>
    %170 = math.exp %169 : vector<8x128xf32>
    %cst_82 = arith.constant 1.000000e+00 : f32
    %171 = vector.broadcast %cst_82 : f32 to vector<8x128xf32>
    %172 = arith.addf %171, %170 : vector<8x128xf32>
    %173 = arith.divf %171, %172 : vector<8x128xf32>
    %174 = arith.mulf %165, %147 : vector<8x128xf32>
    %175 = arith.mulf %159, %167 : vector<8x128xf32>
    %176 = arith.addf %174, %175 : vector<8x128xf32>
    %177 = math.tanh %176 : vector<8x128xf32>
    %178 = arith.mulf %173, %177 : vector<8x128xf32>
    %c4_83 = arith.constant 4 : index
    %c0_84 = arith.constant 0 : index
    %c0_85 = arith.constant 0 : index
    %179 = vector.load %arg14[%c4_83, %c0_84, %c0_85] : memref<8x8x512xf32, #tpu.memory_space<vmem>>, vector<1x8x512xf32>
    %180 = vector.shape_cast %179 : vector<1x8x512xf32> to vector<8x512xf32>
    %cst_86 = arith.constant dense<0.000000e+00> : vector<8x512xf32>
    %181 = tpu.matmul %178, %60, %cst_86 {dimension_numbers = #tpu.dot_dimension_numbers<[1], [0], [0], [1], [0, 0, 1, 1], [], []>} : vector<8x128xf32>, vector<128x512xf32>, vector<8x512xf32> -> vector<8x512xf32>
    %182 = arith.addf %180, %181 : vector<8x512xf32>
    %183 = vector.extract_strided_slice %182 {offsets = [0, 0], sizes = [8, 128], strides = [1, 1]} : vector<8x512xf32> to vector<8x128xf32>
    %184 = arith.negf %183 : vector<8x128xf32>
    %185 = math.exp %184 : vector<8x128xf32>
    %cst_87 = arith.constant 1.000000e+00 : f32
    %186 = vector.broadcast %cst_87 : f32 to vector<8x128xf32>
    %187 = arith.addf %186, %185 : vector<8x128xf32>
    %188 = arith.divf %186, %187 : vector<8x128xf32>
    %189 = vector.extract_strided_slice %182 {offsets = [0, 128], sizes = [8, 128], strides = [1, 1]} : vector<8x512xf32> to vector<8x128xf32>
    %190 = arith.negf %189 : vector<8x128xf32>
    %191 = math.exp %190 : vector<8x128xf32>
    %cst_88 = arith.constant 1.000000e+00 : f32
    %192 = vector.broadcast %cst_88 : f32 to vector<8x128xf32>
    %193 = arith.addf %192, %191 : vector<8x128xf32>
    %194 = arith.divf %192, %193 : vector<8x128xf32>
    %195 = vector.extract_strided_slice %182 {offsets = [0, 256], sizes = [8, 128], strides = [1, 1]} : vector<8x512xf32> to vector<8x128xf32>
    %196 = math.tanh %195 : vector<8x128xf32>
    %197 = vector.extract_strided_slice %182 {offsets = [0, 384], sizes = [8, 128], strides = [1, 1]} : vector<8x512xf32> to vector<8x128xf32>
    %198 = arith.negf %197 : vector<8x128xf32>
    %199 = math.exp %198 : vector<8x128xf32>
    %cst_89 = arith.constant 1.000000e+00 : f32
    %200 = vector.broadcast %cst_89 : f32 to vector<8x128xf32>
    %201 = arith.addf %200, %199 : vector<8x128xf32>
    %202 = arith.divf %200, %201 : vector<8x128xf32>
    %203 = arith.mulf %194, %176 : vector<8x128xf32>
    %204 = arith.mulf %188, %196 : vector<8x128xf32>
    %205 = arith.addf %203, %204 : vector<8x128xf32>
    %206 = math.tanh %205 : vector<8x128xf32>
    %207 = arith.mulf %202, %206 : vector<8x128xf32>
    %c5_90 = arith.constant 5 : index
    %c0_91 = arith.constant 0 : index
    %c0_92 = arith.constant 0 : index
    %208 = vector.load %arg14[%c5_90, %c0_91, %c0_92] : memref<8x8x512xf32, #tpu.memory_space<vmem>>, vector<1x8x512xf32>
    %209 = vector.shape_cast %208 : vector<1x8x512xf32> to vector<8x512xf32>
    %cst_93 = arith.constant dense<0.000000e+00> : vector<8x512xf32>
    %210 = tpu.matmul %207, %60, %cst_93 {dimension_numbers = #tpu.dot_dimension_numbers<[1], [0], [0], [1], [0, 0, 1, 1], [], []>} : vector<8x128xf32>, vector<128x512xf32>, vector<8x512xf32> -> vector<8x512xf32>
    %211 = arith.addf %209, %210 : vector<8x512xf32>
    %212 = vector.extract_strided_slice %211 {offsets = [0, 0], sizes = [8, 128], strides = [1, 1]} : vector<8x512xf32> to vector<8x128xf32>
    %213 = arith.negf %212 : vector<8x128xf32>
    %214 = math.exp %213 : vector<8x128xf32>
    %cst_94 = arith.constant 1.000000e+00 : f32
    %215 = vector.broadcast %cst_94 : f32 to vector<8x128xf32>
    %216 = arith.addf %215, %214 : vector<8x128xf32>
    %217 = arith.divf %215, %216 : vector<8x128xf32>
    %218 = vector.extract_strided_slice %211 {offsets = [0, 128], sizes = [8, 128], strides = [1, 1]} : vector<8x512xf32> to vector<8x128xf32>
    %219 = arith.negf %218 : vector<8x128xf32>
    %220 = math.exp %219 : vector<8x128xf32>
    %cst_95 = arith.constant 1.000000e+00 : f32
    %221 = vector.broadcast %cst_95 : f32 to vector<8x128xf32>
    %222 = arith.addf %221, %220 : vector<8x128xf32>
    %223 = arith.divf %221, %222 : vector<8x128xf32>
    %224 = vector.extract_strided_slice %211 {offsets = [0, 256], sizes = [8, 128], strides = [1, 1]} : vector<8x512xf32> to vector<8x128xf32>
    %225 = math.tanh %224 : vector<8x128xf32>
    %226 = vector.extract_strided_slice %211 {offsets = [0, 384], sizes = [8, 128], strides = [1, 1]} : vector<8x512xf32> to vector<8x128xf32>
    %227 = arith.negf %226 : vector<8x128xf32>
    %228 = math.exp %227 : vector<8x128xf32>
    %cst_96 = arith.constant 1.000000e+00 : f32
    %229 = vector.broadcast %cst_96 : f32 to vector<8x128xf32>
    %230 = arith.addf %229, %228 : vector<8x128xf32>
    %231 = arith.divf %229, %230 : vector<8x128xf32>
    %232 = arith.mulf %223, %205 : vector<8x128xf32>
    %233 = arith.mulf %217, %225 : vector<8x128xf32>
    %234 = arith.addf %232, %233 : vector<8x128xf32>
    %235 = math.tanh %234 : vector<8x128xf32>
    %236 = arith.mulf %231, %235 : vector<8x128xf32>
    %c6_97 = arith.constant 6 : index
    %c0_98 = arith.constant 0 : index
    %c0_99 = arith.constant 0 : index
    %237 = vector.load %arg14[%c6_97, %c0_98, %c0_99] : memref<8x8x512xf32, #tpu.memory_space<vmem>>, vector<1x8x512xf32>
    %238 = vector.shape_cast %237 : vector<1x8x512xf32> to vector<8x512xf32>
    %cst_100 = arith.constant dense<0.000000e+00> : vector<8x512xf32>
    %239 = tpu.matmul %236, %60, %cst_100 {dimension_numbers = #tpu.dot_dimension_numbers<[1], [0], [0], [1], [0, 0, 1, 1], [], []>} : vector<8x128xf32>, vector<128x512xf32>, vector<8x512xf32> -> vector<8x512xf32>
    %240 = arith.addf %238, %239 : vector<8x512xf32>
    %241 = vector.extract_strided_slice %240 {offsets = [0, 0], sizes = [8, 128], strides = [1, 1]} : vector<8x512xf32> to vector<8x128xf32>
    %242 = arith.negf %241 : vector<8x128xf32>
    %243 = math.exp %242 : vector<8x128xf32>
    %cst_101 = arith.constant 1.000000e+00 : f32
    %244 = vector.broadcast %cst_101 : f32 to vector<8x128xf32>
    %245 = arith.addf %244, %243 : vector<8x128xf32>
    %246 = arith.divf %244, %245 : vector<8x128xf32>
    %247 = vector.extract_strided_slice %240 {offsets = [0, 128], sizes = [8, 128], strides = [1, 1]} : vector<8x512xf32> to vector<8x128xf32>
    %248 = arith.negf %247 : vector<8x128xf32>
    %249 = math.exp %248 : vector<8x128xf32>
    %cst_102 = arith.constant 1.000000e+00 : f32
    %250 = vector.broadcast %cst_102 : f32 to vector<8x128xf32>
    %251 = arith.addf %250, %249 : vector<8x128xf32>
    %252 = arith.divf %250, %251 : vector<8x128xf32>
    %253 = vector.extract_strided_slice %240 {offsets = [0, 256], sizes = [8, 128], strides = [1, 1]} : vector<8x512xf32> to vector<8x128xf32>
    %254 = math.tanh %253 : vector<8x128xf32>
    %255 = vector.extract_strided_slice %240 {offsets = [0, 384], sizes = [8, 128], strides = [1, 1]} : vector<8x512xf32> to vector<8x128xf32>
    %256 = arith.negf %255 : vector<8x128xf32>
    %257 = math.exp %256 : vector<8x128xf32>
    %cst_103 = arith.constant 1.000000e+00 : f32
    %258 = vector.broadcast %cst_103 : f32 to vector<8x128xf32>
    %259 = arith.addf %258, %257 : vector<8x128xf32>
    %260 = arith.divf %258, %259 : vector<8x128xf32>
    %261 = arith.mulf %252, %234 : vector<8x128xf32>
    %262 = arith.mulf %246, %254 : vector<8x128xf32>
    %263 = arith.addf %261, %262 : vector<8x128xf32>
    %264 = math.tanh %263 : vector<8x128xf32>
    %265 = arith.mulf %260, %264 : vector<8x128xf32>
    %c7_104 = arith.constant 7 : index
    %c0_105 = arith.constant 0 : index
    %c0_106 = arith.constant 0 : index
    %266 = vector.load %arg14[%c7_104, %c0_105, %c0_106] : memref<8x8x512xf32, #tpu.memory_space<vmem>>, vector<1x8x512xf32>
    %267 = vector.shape_cast %266 : vector<1x8x512xf32> to vector<8x512xf32>
    %cst_107 = arith.constant dense<0.000000e+00> : vector<8x512xf32>
    %268 = tpu.matmul %265, %60, %cst_107 {dimension_numbers = #tpu.dot_dimension_numbers<[1], [0], [0], [1], [0, 0, 1, 1], [], []>} : vector<8x128xf32>, vector<128x512xf32>, vector<8x512xf32> -> vector<8x512xf32>
    %269 = arith.addf %267, %268 : vector<8x512xf32>
    %270 = vector.extract_strided_slice %269 {offsets = [0, 0], sizes = [8, 128], strides = [1, 1]} : vector<8x512xf32> to vector<8x128xf32>
    %271 = arith.negf %270 : vector<8x128xf32>
    %272 = math.exp %271 : vector<8x128xf32>
    %cst_108 = arith.constant 1.000000e+00 : f32
    %273 = vector.broadcast %cst_108 : f32 to vector<8x128xf32>
    %274 = arith.addf %273, %272 : vector<8x128xf32>
    %275 = arith.divf %273, %274 : vector<8x128xf32>
    %276 = vector.extract_strided_slice %269 {offsets = [0, 128], sizes = [8, 128], strides = [1, 1]} : vector<8x512xf32> to vector<8x128xf32>
    %277 = arith.negf %276 : vector<8x128xf32>
    %278 = math.exp %277 : vector<8x128xf32>
    %cst_109 = arith.constant 1.000000e+00 : f32
    %279 = vector.broadcast %cst_109 : f32 to vector<8x128xf32>
    %280 = arith.addf %279, %278 : vector<8x128xf32>
    %281 = arith.divf %279, %280 : vector<8x128xf32>
    %282 = vector.extract_strided_slice %269 {offsets = [0, 256], sizes = [8, 128], strides = [1, 1]} : vector<8x512xf32> to vector<8x128xf32>
    %283 = math.tanh %282 : vector<8x128xf32>
    %284 = vector.extract_strided_slice %269 {offsets = [0, 384], sizes = [8, 128], strides = [1, 1]} : vector<8x512xf32> to vector<8x128xf32>
    %285 = arith.negf %284 : vector<8x128xf32>
    %286 = math.exp %285 : vector<8x128xf32>
    %cst_110 = arith.constant 1.000000e+00 : f32
    %287 = vector.broadcast %cst_110 : f32 to vector<8x128xf32>
    %288 = arith.addf %287, %286 : vector<8x128xf32>
    %289 = arith.divf %287, %288 : vector<8x128xf32>
    %290 = arith.mulf %281, %263 : vector<8x128xf32>
    %291 = arith.mulf %275, %283 : vector<8x128xf32>
    %292 = arith.addf %290, %291 : vector<8x128xf32>
    %293 = math.tanh %292 : vector<8x128xf32>
    %294 = arith.mulf %289, %293 : vector<8x128xf32>
    %c0_111 = arith.constant 0 : index
    %c0_112 = arith.constant 0 : index
    %295 = vector.load %arg5[%c0_111, %c0_112] : memref<128x256xf32, #tpu.memory_space<vmem>>, vector<128x256xf32>
    %cst_113 = arith.constant dense<0.000000e+00> : vector<8x256xf32>
    %296 = tpu.matmul %294, %295, %cst_113 {dimension_numbers = #tpu.dot_dimension_numbers<[1], [0], [0], [1], [0, 0, 1, 1], [], []>} : vector<8x128xf32>, vector<128x256xf32>, vector<8x256xf32> -> vector<8x256xf32>
    %c0_114 = arith.constant 0 : index
    %c0_115 = arith.constant 0 : index
    %297 = vector.load %arg6[%c0_114, %c0_115] : memref<1x256xf32, #tpu.memory_space<vmem>>, vector<1x256xf32>
    %298 = vector.broadcast %297 : vector<1x256xf32> to vector<8x256xf32>
    %299 = arith.addf %296, %298 : vector<8x256xf32>
    %cst_116 = arith.constant 0.000000e+00 : f32
    %300 = vector.broadcast %cst_116 : f32 to vector<8x256xf32>
    %301 = arith.maximumf %299, %300 : vector<8x256xf32>
    %c0_117 = arith.constant 0 : index
    %c0_118 = arith.constant 0 : index
    %302 = vector.load %arg7[%c0_117, %c0_118] : memref<256x128xf32, #tpu.memory_space<vmem>>, vector<256x128xf32>
    %cst_119 = arith.constant dense<0.000000e+00> : vector<8x128xf32>
    %303 = tpu.matmul %301, %302, %cst_119 {dimension_numbers = #tpu.dot_dimension_numbers<[1], [0], [0], [1], [0, 0, 1, 1], [], []>} : vector<8x256xf32>, vector<256x128xf32>, vector<8x128xf32> -> vector<8x128xf32>
    %c0_120 = arith.constant 0 : index
    %c0_121 = arith.constant 0 : index
    %304 = vector.load %arg8[%c0_120, %c0_121] : memref<1x128xf32, #tpu.memory_space<vmem>>, vector<1x128xf32>
    %305 = vector.broadcast %304 : vector<1x128xf32> to vector<8x128xf32>
    %306 = arith.addf %303, %305 : vector<8x128xf32>
    %cst_122 = arith.constant 0.000000e+00 : f32
    %307 = vector.broadcast %cst_122 : f32 to vector<8x128xf32>
    %308 = arith.maximumf %306, %307 : vector<8x128xf32>
    %c0_123 = arith.constant 0 : index
    %c0_124 = arith.constant 0 : index
    %309 = vector.load %arg9[%c0_123, %c0_124] : memref<1x128xf32, #tpu.memory_space<vmem>>, vector<1x128xf32>
    %310 = vector.broadcast %309 : vector<1x128xf32> to vector<8x128xf32>
    %311 = arith.mulf %308, %310 : vector<8x128xf32>
    %cst_125 = arith.constant dense<0.000000e+00> : vector<8xf32>
    %312 = vector.multi_reduction <add>, %311, %cst_125 [1] : vector<8x128xf32> to vector<8xf32>
    %313 = vector.shape_cast %312 : vector<8xf32> to vector<8x1xf32>
    %c0_126 = arith.constant 0 : index
    %c0_127 = arith.constant 0 : index
    %314 = vector.load %arg10[%c0_126, %c0_127] : memref<1x1xf32, #tpu.memory_space<vmem>>, vector<1x1xf32>
    %315 = vector.broadcast %314 : vector<1x1xf32> to vector<8x1xf32>
    %316 = arith.addf %313, %315 : vector<8x1xf32>
    %317 = vector.shape_cast %316 : vector<8x1xf32> to vector<8x1xf32>
    %318 = vector.broadcast %317 : vector<8x1xf32> to vector<8x128xf32>
    %c0_128 = arith.constant 0 : index
    %c0_129 = arith.constant 0 : index
    %319 = vector.load %arg11[%c0_128, %c0_129] : memref<8x128xf32, #tpu.memory_space<vmem>>, vector<8x128xf32>
    tpu.vector_store %arg11[%c0_128, %c0_129], %318 {strides = array<i32>} : memref<8x128xf32, #tpu.memory_space<vmem>>, vector<8x128xf32>,
    %c0_130 = arith.constant 0 : index
    %c0_131 = arith.constant 0 : index
    %320 = vector.load %arg12[%c0_130, %c0_131] : memref<8x128xf32, #tpu.memory_space<vmem>>, vector<8x128xf32>
    tpu.vector_store %arg12[%c0_130, %c0_131], %294 {strides = array<i32>} : memref<8x128xf32, #tpu.memory_space<vmem>>, vector<8x128xf32>,
    %c0_132 = arith.constant 0 : index
    %c0_133 = arith.constant 0 : index
    %321 = vector.load %arg13[%c0_132, %c0_133] : memref<8x128xf32, #tpu.memory_space<vmem>>, vector<8x128xf32>
    tpu.vector_store %arg13[%c0_132, %c0_133], %292 {strides = array<i32>} : memref<8x128xf32, #tpu.memory_space<vmem>>, vector<8x128xf32>,
    return
  }
  func.func @transform_0(%arg0: i32) -> (i32, i32, i32) {
    %c0_i32 = arith.constant 0 : i32
    %c0_i32_0 = arith.constant 0 : i32
    %c0_i32_1 = arith.constant 0 : i32
    return %c0_i32, %arg0, %c0_i32_0 : i32, i32, i32
  }
  func.func @transform_1(%arg0: i32) -> (i32, i32) {
    %c0_i32 = arith.constant 0 : i32
    %c0_i32_0 = arith.constant 0 : i32
    %c0_i32_1 = arith.constant 0 : i32
    return %c0_i32, %c0_i32_0 : i32, i32
  }
  func.func @transform_2(%arg0: i32) -> (i32, i32) {
    %c0_i32 = arith.constant 0 : i32
    %c0_i32_0 = arith.constant 0 : i32
    %c0_i32_1 = arith.constant 0 : i32
    return %c0_i32, %c0_i32_0 : i32, i32
  }
  func.func @transform_3(%arg0: i32) -> (i32, i32) {
    %c0_i32 = arith.constant 0 : i32
    %c0_i32_0 = arith.constant 0 : i32
    %c0_i32_1 = arith.constant 0 : i32
    return %c0_i32, %c0_i32_0 : i32, i32
  }
  func.func @transform_4(%arg0: i32) -> (i32, i32) {
    %c0_i32 = arith.constant 0 : i32
    %c0_i32_0 = arith.constant 0 : i32
    %c0_i32_1 = arith.constant 0 : i32
    return %c0_i32, %c0_i32_0 : i32, i32
  }
  func.func @transform_5(%arg0: i32) -> (i32, i32) {
    %c0_i32 = arith.constant 0 : i32
    %c0_i32_0 = arith.constant 0 : i32
    %c0_i32_1 = arith.constant 0 : i32
    return %c0_i32, %c0_i32_0 : i32, i32
  }
  func.func @transform_6(%arg0: i32) -> (i32, i32) {
    %c0_i32 = arith.constant 0 : i32
    %c0_i32_0 = arith.constant 0 : i32
    %c0_i32_1 = arith.constant 0 : i32
    return %c0_i32, %c0_i32_0 : i32, i32
  }
  func.func @transform_7(%arg0: i32) -> (i32, i32) {
    %c0_i32 = arith.constant 0 : i32
    %c0_i32_0 = arith.constant 0 : i32
    %c0_i32_1 = arith.constant 0 : i32
    return %c0_i32, %c0_i32_0 : i32, i32
  }
  func.func @transform_8(%arg0: i32) -> (i32, i32) {
    %c0_i32 = arith.constant 0 : i32
    %c0_i32_0 = arith.constant 0 : i32
    %c0_i32_1 = arith.constant 0 : i32
    return %c0_i32, %c0_i32_0 : i32, i32
  }
  func.func @transform_9(%arg0: i32) -> (i32, i32) {
    %c0_i32 = arith.constant 0 : i32
    %c0_i32_0 = arith.constant 0 : i32
    %c0_i32_1 = arith.constant 0 : i32
    return %c0_i32, %c0_i32_0 : i32, i32
  }
  func.func @transform_10(%arg0: i32) -> (i32, i32) {
    %c0_i32 = arith.constant 0 : i32
    %c0_i32_0 = arith.constant 0 : i32
    return %arg0, %c0_i32 : i32, i32
  }
  func.func @transform_11(%arg0: i32) -> (i32, i32) {
    %c0_i32 = arith.constant 0 : i32
    %c0_i32_0 = arith.constant 0 : i32
    return %arg0, %c0_i32 : i32, i32
  }
  func.func @transform_12(%arg0: i32) -> (i32, i32) {
    %c0_i32 = arith.constant 0 : i32
    %c0_i32_0 = arith.constant 0 : i32
    return %arg0, %c0_i32 : i32, i32
  }
}

</mosaic_0001>

<bundles_post_ra>
// kernel: lstm_critic_forward.1
= control target key start
LH: loop header
LB: loop body
LE: loop exit
PB: predicated region body
PF: predicated region fallthrough
CT: control target
= control target key end

     0   :  { %s5245_s0 = inlined_call_operand.vmem [shape: f32[8,8,60], index: 0, kind: input, shape index: {}]   ;;  %s5246_s1 = inlined_call_operand.hbm [shape: f32[60,512], index: 1, kind: input, shape index: {}]   ;;  %s5247_s2 = inlined_call_operand.hbm [shape: f32[128,512], index: 2, kind: input, shape index: {}]   ;;  %s5248_s3 = inlined_call_operand.vmem [shape: f32[1,512], index: 3, kind: input, shape index: {}]   ;;  %s5249_s4 = inlined_call_operand.hbm [shape: f32[128,256], index: 4, kind: input, shape index: {}]   ;;  %s5250_s5 = inlined_call_operand.vmem [shape: f32[1,256], index: 5, kind: input, shape index: {}]   ;;  %s5251_s6 = inlined_call_operand.hbm [shape: f32[256,128], index: 6, kind: input, shape index: {}]   ;;  %s5252_s7 = inlined_call_operand.vmem [shape: f32[1,128], index: 7, kind: input, shape index: {}]   ;;  %s5253_s8 = inlined_call_operand.vmem [shape: f32[1,128], index: 8, kind: input, shape index: {}]   ;;  %s5254_s9 = inlined_call_operand.<no memory space> [shape: f32[1,1], index: 9, kind: input, shape index: {}]   ;;  %s5255_s10 = inlined_call_operand.vmem [shape: f32[8,128], index: 10, kind: output, shape index: {0}]   ;;  %s5256_s11 = inlined_call_operand.vmem [shape: f32[8,128], index: 11, kind: output, shape index: {1}]   ;;  %s5257_s12 = inlined_call_operand.vmem [shape: f32[8,128], index: 12, kind: output, shape index: {2}]  }
   0x1   :  { %v18_v0 = vstv %s5254_s9 }
   0x2   :  { %19 = vst [vmem:[#allocation3] sm:$0x1] %v18_v0 }
   0x3   :  { %20 = vsyncpa [#allocation5], 0 }
   0x4   :  { %21 = vsyncpa [#allocation7], 0 }
   0x5   :  { %22 = vsyncpa [#allocation10], 0  ;;  %s4382_s23 = smov [#allocation6]   ;;  %s4383_s25 = smov [#allocation4]  }
   0x6   :  { %s42_s24 = sshll.u32 %s4382_s23, 4  ;;  %s30_s26 = sshll.u32 %s4383_s25, 4  ;;  %s43_s24 = int_to_ptr.vmem [resolvable:$true] %s42_s24  ;;  %s4463_s26 = int_to_ptr.vmem [resolvable:$true] %s30_s26 }
   0x7   :  { %s4288_s29 = scalar_lea.hbm %s5247_s2, 8192 }
   0x8   :  { %p4289_p0 = scmp.ne.s32.totalorder %s5247_s2, %s4288_s29  ;;  %p4292_p1 = scmp.lt.u32.totalorder %s4288_s29, %s5247_s2 }
   0xa   :  { %p4294_p2 = pnand %p4292_p1, %p4289_p0 }
   0xc   :  { %4297 = shalt.err (!%p4294_p2)
}
   0xd   :  { %s4298_s15 = scalar_lea.vmem %s43_s24, 8192  ;;  %p4303_p4 = scmp.lt.s32.totalorder %s43_s24, %s43_s24 }
   0xe   :  { %p4299_p3 = scmp.ne.s32.totalorder %s43_s24, %s4298_s15  ;;  %p4304_p5 = scmp.lt.s32.totalorder %s4298_s15, %s4298_s15 }
  0x10   :  { %p4305_p6 = por %p4304_p5, %p4303_p4 }
  0x12   :  { %p4306_p7 = pnand %p4305_p6, %p4299_p3 }
  0x14   :  { %4309 = shalt.err (!%p4306_p7)
}
  0x15   :  { %s4384_s16 = smov 512   ;;  %s4385_s17 = smov 32  }
  0x16   :  { %48 = dma.hbm_to_vmem [thread:$0]  %s5247_s2, 8192, %s43_s24, [#allocation7], %s4384_s16, %s4384_s16, %s4385_s17  }
  0x17   :  { %s4310_s22 = scalar_lea.hbm %s5246_s1, 4096 }
  0x18   :  { %p4311_p8 = scmp.ne.s32.totalorder %s5246_s1, %s4310_s22  ;;  %p4314_p9 = scmp.lt.u32.totalorder %s4310_s22, %s5246_s1 }
  0x1a   :  { %p4316_p10 = pnand %p4314_p9, %p4311_p8 }
  0x1c   :  { %4319 = shalt.err (!%p4316_p10)
}
  0x1d   :  { %s4320_s29 = scalar_lea.vmem %s4463_s26, 4096  ;;  %p4325_p12 = scmp.lt.s32.totalorder %s4463_s26, %s4463_s26 }
  0x1e   :  { %p4321_p11 = scmp.ne.s32.totalorder %s4463_s26, %s4320_s29  ;;  %p4326_p13 = scmp.lt.s32.totalorder %s4320_s29, %s4320_s29 }
  0x20   :  { %p4327_p0 = por %p4326_p13, %p4325_p12 }
  0x22   :  { %p4328_p1 = pnand %p4327_p0, %p4321_p11 }
  0x24   :  { %4331 = shalt.err (!%p4328_p1)
}
  0x25   :  { %36 = dma.hbm_to_vmem [thread:$0]  %s5246_s1, 4096, %s4463_s26, [#allocation5], %s4384_s16, %s4384_s16, %s4385_s17  }
  0x26   :  { %s4386_s30 = smov [#allocation8]   ;;  %s4332_s15 = scalar_lea.hbm %s5249_s4, 4096 }
  0x27   :  { %s56_s13 = sshll.u32 %s4386_s30, 4  ;;  %p4333_p2 = scmp.ne.s32.totalorder %s5249_s4, %s4332_s15  ;;  %s57_s13 = int_to_ptr.vmem [resolvable:$true] %s56_s13 }
  0x28   :  { %p4336_p3 = scmp.lt.u32.totalorder %s4332_s15, %s5249_s4 }
  0x2a   :  { %p4338_p4 = pnand %p4336_p3, %p4333_p2 }
  0x2c   :  { %4341 = shalt.err (!%p4338_p4)
}
  0x2d   :  { %s4342_s22 = scalar_lea.vmem %s57_s13, 4096  ;;  %p4347_p6 = scmp.lt.s32.totalorder %s57_s13, %s57_s13 }
  0x2e   :  { %p4343_p5 = scmp.ne.s32.totalorder %s57_s13, %s4342_s22  ;;  %p4348_p7 = scmp.lt.s32.totalorder %s4342_s22, %s4342_s22 }
  0x30   :  { %p4349_p8 = por %p4348_p7, %p4347_p6 }
  0x32   :  { %p4350_p9 = pnand %p4349_p8, %p4343_p5 }
  0x34   :  { %4353 = shalt.err (!%p4350_p9)
}
  0x35   :  { %s4387_s1 = smov 256   ;;  %s4388_s26 = smov 16  }
  0x36   :  { %62 = dma.hbm_to_vmem [thread:$0]  %s5249_s4, 4096, %s57_s13, [#allocation7], %s4387_s1, %s4387_s1, %s4388_s26  }
  0x37   :  { %s4389_s23 = smov [#allocation9]   ;;  %s4354_s29 = scalar_lea.hbm %s5251_s6, 4096 }
  0x38   :  { %s70_s25 = sshll.u32 %s4389_s23, 4  ;;  %p4355_p10 = scmp.ne.s32.totalorder %s5251_s6, %s4354_s29  ;;  %s71_s25 = int_to_ptr.vmem [resolvable:$true] %s70_s25 }
  0x39   :  { %p4358_p11 = scmp.lt.u32.totalorder %s4354_s29, %s5251_s6 }
  0x3b   :  { %p4360_p12 = pnand %p4358_p11, %p4355_p10 }
  0x3d   :  { %4363 = shalt.err (!%p4360_p12)
}
  0x3e   :  { %s4364_s14 = scalar_lea.vmem %s71_s25, 4096  ;;  %p4369_p0 = scmp.lt.s32.totalorder %s71_s25, %s71_s25 }
  0x3f   :  { %p4365_p13 = scmp.ne.s32.totalorder %s71_s25, %s4364_s14  ;;  %p4370_p1 = scmp.lt.s32.totalorder %s4364_s14, %s4364_s14 }
  0x41   :  { %p4371_p2 = por %p4370_p1, %p4369_p0 }
  0x43   :  { %p4372_p3 = pnand %p4371_p2, %p4365_p13 }
  0x45   :  { %4375 = shalt.err (!%p4372_p3)
}
  0x46   :  { %s4390_s4 = smov 128   ;;  %s4391_s13 = smov 8  }
  0x47   :  { %76 = dma.hbm_to_vmem [thread:$0]  %s5251_s6, 4096, %s71_s25, [#allocation10], %s4390_s4, %s4390_s4, %s4391_s13  }
  0x48   :  { %4376 = dma.done.wait [#allocation5], 4096  }
  0x49   :  { %4377 = vsyncadd [#allocation5], 4294963200 }
  0x4a   :  { %4378 = dma.done.wait [#allocation7], 12288  }
  0x4b   :  { %4379 = vsyncadd [#allocation7], 4294955008 }
  0x4c   :  { %4380 = dma.done.wait [#allocation10], 4096  }
  0x4d   :  { %4381 = vsyncadd [#allocation10], 4294963200  ;;  %v4392_v1 = vmov 0.0   ;;  %v96_v2 = vld [vmem:[#allocation4 + $0x8] sm:$0xff]  ;;  %v98_v4 = vld [vmem:[#allocation4 + $0x18] sm:$0xff]  ;;  %vm154_vm0 = vcmask 1043456  }
  0x4e   :  { %231 = vmatprep.mubr.f32.mxu0 %v4392_v1  ;;  %302 = vmatprep.mubr.f32.mxu1 %v4392_v1  ;;  %v100_v3 = vld [vmem:[#allocation4 + $0x28] sm:$0xff]  ;;  %v102_v6 = vld [vmem:[#allocation4 + $0x38] sm:$0xff]  ;;  %v95_v7 = vld [vmem:[#allocation4] sm:$0xff]  ;;  %vm4393_vm1 = vmmov 1   ;;  %vm150_vm3 = vcmask 490496  }
  0x4f   :  { %v4520_v5 = vpack.c.bf16 %v100_v3, %v96_v2  ;;  %v99_v8 = vld [vmem:[#allocation4 + $0x20] sm:$0xff]  ;;  %v4522_v9 = vpack.c.bf16 %v102_v6, %v98_v4  ;;  %v97_v11 = vld [vmem:[#allocation4 + $0x10] sm:$0xff]  ;;  %v104_v13 = vld [vmem:[#allocation4 + $0x48] sm:$0xff] }
  0x50   :  { %v4524_v10 = vpack.c.bf16 %v99_v8, %v95_v7  ;;  %v101_v12 = vld [vmem:[#allocation4 + $0x30] sm:$0xff]  ;;  %v108_v15 = vld [vmem:[#allocation4 + $0x68] sm:$0xff]  ;;  %v106_v16 = vld [vmem:[#allocation4 + $0x58] sm:$0xff] }
  0x51   :  { %3219 = vmatprep.subr.bf16.mxu0 %v4520_v5  ;;  %v4527_v14 = vpack.c.bf16 %v101_v12, %v97_v11  ;;  %v110_v17 = vld [vmem:[#allocation4 + $0x78] sm:$0xff]  ;;  %3237 = vmatprep.subr.bf16.mxu1 %v4522_v9  ;;  %v4531_v18 = vpack.c.bf16 %v108_v15, %v104_v13  ;;  %v103_v20 = vld [vmem:[#allocation4 + $0x40] sm:$0xff]  ;;  %v105_v22 = vld [vmem:[#allocation4 + $0x50] sm:$0xff] }
  0x52   :  { %3221 = vmatpush1.bf16.msra.mxu0 %v4524_v10  ;;  %v4533_v19 = vpack.c.bf16 %v110_v17, %v106_v16  ;;  %v107_v21 = vld [vmem:[#allocation4 + $0x60] sm:$0xff]  ;;  %v109_v24 = vld [vmem:[#allocation4 + $0x70] sm:$0xff]  ;;  %v112_v25 = vld [vmem:[#allocation4 + $0x88] sm:$0xff] }
  0x53   :  { %3239 = vmatpush1.bf16.msra.mxu1 %v4527_v14  ;;  %v4536_v23 = vpack.c.bf16 %v107_v21, %v103_v20  ;;  %v116_v26 = vld [vmem:[#allocation4 + $0xa8] sm:$0xff]  ;;  %3223 = vmatprep.subr.bf16.mxu0 %v4531_v18  ;;  %v4540_v27 = vpack.c.bf16 %v109_v24, %v105_v22  ;;  %v114_v29 = vld [vmem:[#allocation4 + $0x98] sm:$0xff]  ;;  %v111_v31 = vld [vmem:[#allocation4 + $0x80] sm:$0xff] }
  0x54   :  { %3241 = vmatprep.subr.bf16.mxu1 %v4533_v19  ;;  %v4542_v28 = vpack.c.bf16 %v116_v26, %v112_v25  ;;  %v118_v30 = vld [vmem:[#allocation4 + $0xb8] sm:$0xff]  ;;  %v115_v33 = vld [vmem:[#allocation4 + $0xa0] sm:$0xff]  ;;  %v113_v34 = vld [vmem:[#allocation4 + $0x90] sm:$0xff] }
  0x55   :  { %v4544_v32 = vpack.c.bf16 %v118_v30, %v114_v29  ;;  %v117_v35 = vld [vmem:[#allocation4 + $0xb0] sm:$0xff]  ;;  %v4547_v36 = vpack.c.bf16 %v115_v33, %v111_v31  ;;  %v120_v37 = vld [vmem:[#allocation4 + $0xc8] sm:$0xff]  ;;  %v122_v39 = vld [vmem:[#allocation4 + $0xd8] sm:$0xff] }
  0x56   :  { %3225 = vmatpush1.bf16.msra.mxu0 %v4536_v23  ;;  %v124_v38 = vld [vmem:[#allocation4 + $0xe8] sm:$0xf]  ;;  %v4551_v40 = vpack.c.bf16 %v117_v35, %v113_v34  ;;  %v126_v42 = vld [vmem:[#allocation4 + $0xf8] sm:$0xf]  ;;  %v119_v43 = vld [vmem:[#allocation4 + $0xc0] sm:$0xff] }
  0x57   :  { %3243 = vmatpush1.bf16.msra.mxu1 %v4540_v27  ;;  %3227 = vmatprep.subr.bf16.mxu0 %v4542_v28  ;;  %v4553_v41 = vpack.c.bf16 %v124_v38, %v120_v37  ;;  %v123_v44 = vld [vmem:[#allocation4 + $0xe0] sm:$0xf]  ;;  %vm4557_vm2 = vmpackc.low %vm154_vm0, %vm4393_vm1  ;;  %v4561_v46 = vpack.c.bf16 %v126_v42, %v122_v39  ;;  %v121_v47 = vld [vmem:[#allocation4 + $0xd0] sm:$0xff] }
  0x58   :  { %3245 = vmatprep.subr.bf16.mxu1 %v4544_v32  ;;  %v125_v48 = vld [vmem:[#allocation4 + $0xf0] sm:$0xf]  ;;  %v4564_v49 = vpack.c.bf16 %v123_v44, %v119_v43  ;;  %v149_v51 = vld [vmem:[%s5245_s0] sm:$0xff]  ;;  %v3107_v52 = vld [vmem:[%s5245_s0 + $0x8] sm:$0xff] }
  0x59   :  { %v4570_v50 = vpack.c.bf16 %v125_v48, %v121_v47  ;;  %v3114_v53 = vld [vmem:[%s5245_s0 + $0x10] sm:$0xff]  ;;  %v3121_v54 = vld [vmem:[%s5245_s0 + $0x18] sm:$0xff]  ;;  %v3128_v55 = vld [vmem:[%s5245_s0 + $0x20] sm:$0xff] }
  0x5a   :  { %3229 = vmatpush1.bf16.msra.mxu0 %v4547_v36  ;;  %v3135_v56 = vld [vmem:[%s5245_s0 + $0x28] sm:$0xff]  ;;  %v3142_v57 = vld [vmem:[%s5245_s0 + $0x30] sm:$0xff]  ;;  %v1380_v60 = vld [vmem:[#allocation6 + $0x18] sm:$0xff] }
  0x5b   :  { %3247 = vmatpush1.bf16.msra.mxu1 %v4551_v40  ;;  %3232 = vmatprep.subr.msk.bf16.mxu0 %vm4557_vm2, %v4553_v41  ;;  %v1378_v58 = vld [vmem:[#allocation6 + $0x8] sm:$0xff]  ;;  %v1384_v61 = vld [vmem:[#allocation6 + $0x38] sm:$0xff]  ;;  %v1377_v63 = vld [vmem:[#allocation6] sm:$0xff] }
  0x5c   :  { %3250 = vmatprep.subr.msk.bf16.mxu1 %vm4557_vm2, %v4561_v46  ;;  %v1382_v59 = vld [vmem:[#allocation6 + $0x28] sm:$0xff]  ;;  %v1381_v0 = vld [vmem:[#allocation6 + $0x20] sm:$0xff]  ;;  %v1379_v2 = vld [vmem:[#allocation6 + $0x10] sm:$0xff]  ;;  %v4794_v3 = vpack.c.bf16 %v1384_v61, %v1380_v60 }
  0x5d   :  { %v4789_v62 = vpack.c.bf16 %v1382_v59, %v1378_v58  ;;  %v1383_v4 = vld [vmem:[#allocation6 + $0x30] sm:$0xff]  ;;  %v1390_v6 = vld [vmem:[#allocation6 + $0x68] sm:$0xff]  ;;  %v1388_v7 = vld [vmem:[#allocation6 + $0x58] sm:$0xff] }
  0x5e   :  { %3235 = vmatpush1.bf16.msk.msra.mxu0 %vm4557_vm2, %v4564_v49  ;;  %v1392_v8 = vld [vmem:[#allocation6 + $0x78] sm:$0xff]  ;;  %v4808_v11 = vpack.c.bf16 %v1383_v4, %v1379_v2  ;;  %v1385_v13 = vld [vmem:[#allocation6 + $0x40] sm:$0xff]  ;;  %v1387_v15 = vld [vmem:[#allocation6 + $0x50] sm:$0xff] }
  0x5f   :  { %3253 = vmatpush1.bf16.msk.msra.mxu1 %vm4557_vm2, %v4570_v50  ;;  %3255 = vmatprep.subr.bf16.mxu0 %v4520_v5  ;;  %v4813_v16 = vpack.c.bf16 %v1392_v8, %v1388_v7  ;;  %v1391_v17 = vld [vmem:[#allocation6 + $0x70] sm:$0xff]  ;;  %v1396_v20 = vld [vmem:[#allocation6 + $0x98] sm:$0xff]  ;;  %v1393_v25 = vld [vmem:[#allocation6 + $0x80] sm:$0xff] }
  0x60   :  { %3273 = vmatprep.subr.bf16.mxu1 %v4522_v9  ;;  %v1400_v21 = vld [vmem:[#allocation6 + $0xb8] sm:$0xff]  ;;  %v1397_v26 = vld [vmem:[#allocation6 + $0xa0] sm:$0xff]  ;;  %v1399_v29 = vld [vmem:[#allocation6 + $0xb0] sm:$0xff] }
  0x61   :  { %3103 = vmatmul.mubr.msk.f32.vlgmr.msra.gmra.mrb[0].mxu0 %vm150_vm3, %v149_v51  ;;  %v1402_v30 = vld [vmem:[#allocation6 + $0xc8] sm:$0xff]  ;;  %v1408_v33 = vld [vmem:[#allocation6 + $0xf8] sm:$0xff]  ;;  %v4832_v34 = vpack.c.bf16 %v1397_v26, %v1393_v25  ;;  %v1401_v37 = vld [vmem:[#allocation6 + $0xc0] sm:$0xff] }
  0x62   :  { %3106 = vmatmul.mubr.msk.f32.vlgmr.msra.gmra.mrb[0].mxu1 %vm150_vm3, %v149_v51  ;;  %3257 = vmatpush1.bf16.msra.mxu0 %v4524_v10  ;;  %v1406_v31 = vld [vmem:[#allocation6 + $0xe8] sm:$0xff]  ;;  %v1405_v38 = vld [vmem:[#allocation6 + $0xe0] sm:$0xff]  ;;  %v1403_v39 = vld [vmem:[#allocation6 + $0xd0] sm:$0xff] }
  0x63   :  { %3275 = vmatpush1.bf16.msra.mxu1 %v4527_v14  ;;  %3259 = vmatprep.subr.bf16.mxu0 %v4531_v18  ;;  %v1410_v42 = vld [vmem:[#allocation6 + $0x108] sm:$0xff]  ;;  %v1412_v44 = vld [vmem:[#allocation6 + $0x118] sm:$0xff]  ;;  %v1411_v51 = vld [vmem:[#allocation6 + $0x110] sm:$0xff] }
  0x64   :  { %3277 = vmatprep.subr.bf16.mxu1 %v4533_v19  ;;  %382 = vmatprep.mubr.f32.mxu0 %v4392_v1  ;;  %v1414_v43 = vld [vmem:[#allocation6 + $0x128] sm:$0xff]  ;;  %v1416_v45 = vld [vmem:[#allocation6 + $0x138] sm:$0xff]  ;;  %v1417_v61 = vld [vmem:[#allocation6 + $0x140] sm:$0xff] }
  0x65   :  { %453 = vmatprep.mubr.f32.mxu1 %v4392_v1  ;;  %v4850_v48 = vpack.c.bf16 %v1414_v43, %v1410_v42  ;;  %v1423_v4 = vld [vmem:[#allocation6 + $0x170] sm:$0xff]  ;;  %v1428_v7 = vld [vmem:[#allocation6 + $0x198] sm:$0xff]  ;;  %v1438_v25 = vld [vmem:[#allocation6 + $0x1e8] sm:$0xff]  ;;  %v129_v43 = vlaneseq }
  0x66   :  { %3261 = vmatpush1.bf16.msra.mxu0 %v4536_v23  ;;  %v1432_v8 = vld [vmem:[#allocation6 + $0x1b8] sm:$0xff] }
  0x67   :  { %3279 = vmatpush1.bf16.msra.mxu1 %v4540_v27  ;;  %3263 = vmatprep.subr.bf16.mxu0 %v4542_v28  ;;  %v1436_v26 = vld [vmem:[#allocation6 + $0x1d8] sm:$0xff] }
  0x68   :  { %3281 = vmatprep.subr.bf16.mxu1 %v4544_v32 }
  0x6a   :  { %3265 = vmatpush1.bf16.msra.mxu0 %v4547_v36 }
  0x6b   :  { %3283 = vmatpush1.bf16.msra.mxu1 %v4551_v40  ;;  %3268 = vmatprep.subr.msk.bf16.mxu0 %vm4557_vm2, %v4553_v41 }
  0x6c   :  { %3286 = vmatprep.subr.msk.bf16.mxu1 %vm4557_vm2, %v4561_v46 }
  0x6e   :  { %3271 = vmatpush1.bf16.msk.msra.mxu0 %vm4557_vm2, %v4564_v49 }
  0x6f   :  { %3289 = vmatpush1.bf16.msk.msra.mxu1 %vm4557_vm2, %v4570_v50  ;;  %3291 = vmatprep.subr.bf16.mxu0 %v4520_v5 }
  0x70   :  { %3309 = vmatprep.subr.bf16.mxu1 %v4522_v9 }
  0x71   :  { %3110 = vmatmul.mubr.msk.f32.vlgmr.msra.gmra.mrb[2].mxu0 %vm150_vm3, %v3107_v52 }
  0x72   :  { %3113 = vmatmul.mubr.msk.f32.vlgmr.msra.gmra.mrb[2].mxu1 %vm150_vm3, %v3107_v52  ;;  %3293 = vmatpush1.bf16.msra.mxu0 %v4524_v10  ;;  %v4853_v52 = vpack.c.bf16 %v1416_v45, %v1412_v44  ;;  %v4939_v44 = vshrl.u32 %v129_v43, 7 }
  0x73   :  { %3311 = vmatpush1.bf16.msra.mxu1 %v4527_v14  ;;  %3295 = vmatprep.subr.bf16.mxu0 %v4531_v18 }
  0x74   :  { %3313 = vmatprep.subr.bf16.mxu1 %v4533_v19  ;;  %534 = vmatprep.mubr.f32.mxu0 %v4392_v1  ;;  %v131_v45 = vsub.s32 0, %v4939_v44 }
  0x75   :  { %605 = vmatprep.mubr.f32.mxu1 %v4392_v1 }
  0x76   :  { %3297 = vmatpush1.bf16.msra.mxu0 %v4536_v23 }
  0x77   :  { %3315 = vmatpush1.bf16.msra.mxu1 %v4540_v27  ;;  %3299 = vmatprep.subr.bf16.mxu0 %v4542_v28 }
  0x78   :  { %3317 = vmatprep.subr.bf16.mxu1 %v4544_v32 }
  0x7a   :  { %3301 = vmatpush1.bf16.msra.mxu0 %v4547_v36 }
  0x7b   :  { %3319 = vmatpush1.bf16.msra.mxu1 %v4551_v40  ;;  %3304 = vmatprep.subr.msk.bf16.mxu0 %vm4557_vm2, %v4553_v41 }
  0x7c   :  { %3322 = vmatprep.subr.msk.bf16.mxu1 %vm4557_vm2, %v4561_v46 }
  0x7e   :  { %3307 = vmatpush1.bf16.msk.msra.mxu0 %vm4557_vm2, %v4564_v49 }
  0x7f   :  { %3325 = vmatpush1.bf16.msk.msra.mxu1 %vm4557_vm2, %v4570_v50  ;;  %3327 = vmatprep.subr.bf16.mxu0 %v4520_v5 }
  0x80   :  { %3345 = vmatprep.subr.bf16.mxu1 %v4522_v9 }
  0x81   :  { %3117 = vmatmul.mubr.msk.f32.vlgmr.msra.gmra.mrb[4].mxu0 %vm150_vm3, %v3114_v53 }
  0x82   :  { %3120 = vmatmul.mubr.msk.f32.vlgmr.msra.gmra.mrb[4].mxu1 %vm150_vm3, %v3114_v53  ;;  %3329 = vmatpush1.bf16.msra.mxu0 %v4524_v10  ;;  %v1415_v53 = vld [vmem:[#allocation6 + $0x130] sm:$0xff] }
  0x83   :  { %3347 = vmatpush1.bf16.msra.mxu1 %v4527_v14  ;;  %3331 = vmatprep.subr.bf16.mxu0 %v4531_v18  ;;  %v4860_v59 = vpack.c.bf16 %v1415_v53, %v1411_v51 }
  0x84   :  { %3349 = vmatprep.subr.bf16.mxu1 %v4533_v19  ;;  %686 = vmatprep.mubr.f32.mxu0 %v4392_v1 }
  0x85   :  { %757 = vmatprep.mubr.f32.mxu1 %v4392_v1 }
  0x86   :  { %3333 = vmatpush1.bf16.msra.mxu0 %v4536_v23 }
  0x87   :  { %3351 = vmatpush1.bf16.msra.mxu1 %v4540_v27  ;;  %3335 = vmatprep.subr.bf16.mxu0 %v4542_v28 }
  0x88   :  { %3353 = vmatprep.subr.bf16.mxu1 %v4544_v32 }
  0x8a   :  { %3337 = vmatpush1.bf16.msra.mxu0 %v4547_v36 }
  0x8b   :  { %3355 = vmatpush1.bf16.msra.mxu1 %v4551_v40  ;;  %3340 = vmatprep.subr.msk.bf16.mxu0 %vm4557_vm2, %v4553_v41 }
  0x8c   :  { %3358 = vmatprep.subr.msk.bf16.mxu1 %vm4557_vm2, %v4561_v46 }
  0x8e   :  { %3343 = vmatpush1.bf16.msk.msra.mxu0 %vm4557_vm2, %v4564_v49 }
  0x8f   :  { %3361 = vmatpush1.bf16.msk.msra.mxu1 %vm4557_vm2, %v4570_v50  ;;  %3363 = vmatprep.subr.bf16.mxu0 %v4520_v5 }
  0x90   :  { %3381 = vmatprep.subr.bf16.mxu1 %v4522_v9 }
  0x91   :  { %3124 = vmatmul.mubr.msk.f32.vlgmr.msra.gmra.mrb[6].mxu0 %vm150_vm3, %v3121_v54 }
  0x92   :  { %3127 = vmatmul.mubr.msk.f32.vlgmr.msra.gmra.mrb[6].mxu1 %vm150_vm3, %v3121_v54  ;;  %3365 = vmatpush1.bf16.msra.mxu0 %v4524_v10  ;;  %v1418_v54 = vld [vmem:[#allocation6 + $0x148] sm:$0xff] }
  0x93   :  { %3383 = vmatpush1.bf16.msra.mxu1 %v4527_v14  ;;  %3367 = vmatprep.subr.bf16.mxu0 %v4531_v18 }
  0x94   :  { %3385 = vmatprep.subr.bf16.mxu1 %v4533_v19  ;;  %838 = vmatprep.mubr.f32.mxu0 %v4392_v1 }
  0x95   :  { %909 = vmatprep.mubr.f32.mxu1 %v4392_v1 }
  0x96   :  { %3369 = vmatpush1.bf16.msra.mxu0 %v4536_v23 }
  0x97   :  { %3387 = vmatpush1.bf16.msra.mxu1 %v4540_v27  ;;  %3371 = vmatprep.subr.bf16.mxu0 %v4542_v28 }
  0x98   :  { %3389 = vmatprep.subr.bf16.mxu1 %v4544_v32 }
  0x9a   :  { %3373 = vmatpush1.bf16.msra.mxu0 %v4547_v36 }
  0x9b   :  { %3391 = vmatpush1.bf16.msra.mxu1 %v4551_v40  ;;  %3376 = vmatprep.subr.msk.bf16.mxu0 %vm4557_vm2, %v4553_v41 }
  0x9c   :  { %3394 = vmatprep.subr.msk.bf16.mxu1 %vm4557_vm2, %v4561_v46 }
  0x9e   :  { %3379 = vmatpush1.bf16.msk.msra.mxu0 %vm4557_vm2, %v4564_v49 }
  0x9f   :  { %3397 = vmatpush1.bf16.msk.msra.mxu1 %vm4557_vm2, %v4570_v50  ;;  %3399 = vmatprep.subr.bf16.mxu0 %v4520_v5 }
  0xa0   :  { %3417 = vmatprep.subr.bf16.mxu1 %v4522_v9 }
  0xa1   :  { %3131 = vmatmul.mubr.msk.f32.vlgmr.msra.gmra.mrb[8].mxu0 %vm150_vm3, %v3128_v55 }
  0xa2   :  { %3134 = vmatmul.mubr.msk.f32.vlgmr.msra.gmra.mrb[8].mxu1 %vm150_vm3, %v3128_v55  ;;  %3401 = vmatpush1.bf16.msra.mxu0 %v4524_v10  ;;  %v1422_v55 = vld [vmem:[#allocation6 + $0x168] sm:$0xff] }
  0xa3   :  { %3419 = vmatpush1.bf16.msra.mxu1 %v4527_v14  ;;  %3403 = vmatprep.subr.bf16.mxu0 %v4531_v18  ;;  %v4862_v60 = vpack.c.bf16 %v1422_v55, %v1418_v54  ;;  %v143_v55 = vsub.s32 3, %v4939_v44 }
  0xa4   :  { %3421 = vmatprep.subr.bf16.mxu1 %v4533_v19  ;;  %990 = vmatprep.mubr.f32.mxu0 %v4392_v1 }
  0xa5   :  { %1061 = vmatprep.mubr.f32.mxu1 %v4392_v1 }
  0xa6   :  { %3405 = vmatpush1.bf16.msra.mxu0 %v4536_v23 }
  0xa7   :  { %3423 = vmatpush1.bf16.msra.mxu1 %v4540_v27  ;;  %3407 = vmatprep.subr.bf16.mxu0 %v4542_v28 }
  0xa8   :  { %3425 = vmatprep.subr.bf16.mxu1 %v4544_v32 }
  0xaa   :  { %3409 = vmatpush1.bf16.msra.mxu0 %v4547_v36 }
  0xab   :  { %3427 = vmatpush1.bf16.msra.mxu1 %v4551_v40  ;;  %3412 = vmatprep.subr.msk.bf16.mxu0 %vm4557_vm2, %v4553_v41 }
  0xac   :  { %3430 = vmatprep.subr.msk.bf16.mxu1 %vm4557_vm2, %v4561_v46 }
  0xae   :  { %3415 = vmatpush1.bf16.msk.msra.mxu0 %vm4557_vm2, %v4564_v49 }
  0xaf   :  { %3433 = vmatpush1.bf16.msk.msra.mxu1 %vm4557_vm2, %v4570_v50  ;;  %3435 = vmatprep.subr.bf16.mxu0 %v4520_v5 }
  0xb0   :  { %3453 = vmatprep.subr.bf16.mxu1 %v4522_v9 }
  0xb1   :  { %3138 = vmatmul.mubr.msk.f32.vlgmr.msra.gmra.mrb[10].mxu0 %vm150_vm3, %v3135_v56 }
  0xb2   :  { %3141 = vmatmul.mubr.msk.f32.vlgmr.msra.gmra.mrb[10].mxu1 %vm150_vm3, %v3135_v56  ;;  %3437 = vmatpush1.bf16.msra.mxu0 %v4524_v10  ;;  %v1420_v56 = vld [vmem:[#allocation6 + $0x158] sm:$0xff] }
  0xb3   :  { %3455 = vmatpush1.bf16.msra.mxu1 %v4527_v14  ;;  %3439 = vmatprep.subr.bf16.mxu0 %v4531_v18 }
  0xb4   :  { %3457 = vmatprep.subr.bf16.mxu1 %v4533_v19  ;;  %1142 = vmatprep.mubr.f32.mxu0 %v4392_v1 }
  0xb5   :  { %1213 = vmatprep.mubr.f32.mxu1 %v4392_v1 }
  0xb6   :  { %3441 = vmatpush1.bf16.msra.mxu0 %v4536_v23 }
  0xb7   :  { %3459 = vmatpush1.bf16.msra.mxu1 %v4540_v27  ;;  %3443 = vmatprep.subr.bf16.mxu0 %v4542_v28 }
  0xb8   :  { %3461 = vmatprep.subr.bf16.mxu1 %v4544_v32 }
  0xba   :  { %3445 = vmatpush1.bf16.msra.mxu0 %v4547_v36 }
  0xbb   :  { %3463 = vmatpush1.bf16.msra.mxu1 %v4551_v40  ;;  %3448 = vmatprep.subr.msk.bf16.mxu0 %vm4557_vm2, %v4553_v41 }
  0xbc   :  { %3466 = vmatprep.subr.msk.bf16.mxu1 %vm4557_vm2, %v4561_v46 }
  0xbe   :  { %3451 = vmatpush1.bf16.msk.msra.mxu0 %vm4557_vm2, %v4564_v49 }
  0xbf   :  { %3469 = vmatpush1.bf16.msk.msra.mxu1 %vm4557_vm2, %v4570_v50  ;;  %3471 = vmatprep.subr.bf16.mxu0 %v4520_v5  ;;  %v1386_v5 = vld [vmem:[#allocation6 + $0x48] sm:$0xff] }
  0xc0   :  { %3489 = vmatprep.subr.bf16.mxu1 %v4522_v9  ;;  %v3149_v9 = vld [vmem:[%s5245_s0 + $0x38] sm:$0xff]  ;;  %v4810_v12 = vpack.c.bf16 %v1390_v6, %v1386_v5  ;;  %v1426_v5 = vld [vmem:[#allocation6 + $0x188] sm:$0xff] }
  0xc1   :  { %3145 = vmatmul.mubr.msk.f32.vlgmr.msra.gmra.mrb[12].mxu0 %vm150_vm3, %v3142_v57  ;;  %v1430_v6 = vld [vmem:[#allocation6 + $0x1a8] sm:$0xff] }
  0xc2   :  { %3148 = vmatmul.mubr.msk.f32.vlgmr.msra.gmra.mrb[12].mxu1 %vm150_vm3, %v3142_v57  ;;  %3473 = vmatpush1.bf16.msra.mxu0 %v4524_v10  ;;  %v4802_v10 = vpack.c.bf16 %v1381_v0, %v1377_v63  ;;  %v1424_v57 = vld [vmem:[#allocation6 + $0x178] sm:$0xff]  ;;  %v1421_v63 = vld [vmem:[#allocation6 + $0x160] sm:$0xff]  ;;  %v1419_v0 = vld [vmem:[#allocation6 + $0x150] sm:$0xff] }
  0xc3   :  { %3491 = vmatpush1.bf16.msra.mxu1 %v4527_v14  ;;  %3475 = vmatprep.subr.bf16.mxu0 %v4531_v18  ;;  %v1389_v14 = vld [vmem:[#allocation6 + $0x60] sm:$0xff]  ;;  %v1394_v18 = vld [vmem:[#allocation6 + $0x88] sm:$0xff]  ;;  %v4865_v2 = vpack.c.bf16 %v1424_v57, %v1420_v56 }
  0xc4   :  { %3493 = vmatprep.subr.bf16.mxu1 %v4533_v19  ;;  %1294 = vmatprep.mubr.f32.mxu0 %v4392_v1  ;;  %v1398_v19 = vld [vmem:[#allocation6 + $0xa8] sm:$0xff]  ;;  %v4818_v22 = vpack.c.bf16 %v1389_v14, %v1385_v13  ;;  %v4872_v13 = vpack.c.bf16 %v1423_v4, %v1419_v0  ;;  %v4874_v14 = vpack.c.bf16 %v1430_v6, %v1426_v5 }
  0xc5   :  { %1365 = vmatprep.mubr.f32.mxu1 %v4392_v1  ;;  %v4824_v24 = vpack.c.bf16 %v1398_v19, %v1394_v18  ;;  %v1427_v18 = vld [vmem:[#allocation6 + $0x190] sm:$0xff]  ;;  %v4877_v19 = vpack.c.bf16 %v1432_v8, %v1428_v7  ;;  %v139_v7 = vsub.s32 2, %v4939_v44 }
  0xc6   :  { %3477 = vmatpush1.bf16.msra.mxu0 %v4536_v23  ;;  %v4822_v23 = vpack.c.bf16 %v1391_v17, %v1387_v15  ;;  %v1425_v15 = vld [vmem:[#allocation6 + $0x180] sm:$0xff] }
  0xc7   :  { %3495 = vmatpush1.bf16.msra.mxu1 %v4540_v27  ;;  %3479 = vmatprep.subr.bf16.mxu0 %v4542_v28  ;;  %v1395_v27 = vld [vmem:[#allocation6 + $0x90] sm:$0xff]  ;;  %v4827_v28 = vpack.c.bf16 %v1400_v21, %v1396_v20  ;;  %v1429_v17 = vld [vmem:[#allocation6 + $0x1a0] sm:$0xff]  ;;  %v1434_v21 = vld [vmem:[#allocation6 + $0x1c8] sm:$0xff] }
  0xc8   :  { %3497 = vmatprep.subr.bf16.mxu1 %v4544_v32  ;;  %v1404_v32 = vld [vmem:[#allocation6 + $0xd8] sm:$0xff]  ;;  %v4836_v35 = vpack.c.bf16 %v1399_v29, %v1395_v27  ;;  %v1431_v20 = vld [vmem:[#allocation6 + $0x1b0] sm:$0xff]  ;;  %v4880_v29 = vpack.c.bf16 %v1429_v17, %v1425_v15 }
  0xc9   :  { %v1440_v27 = vld [vmem:[#allocation6 + $0x1f8] sm:$0xff] }
  0xca   :  { %3481 = vmatpush1.bf16.msra.mxu0 %v4547_v36  ;;  %v4838_v36 = vpack.c.bf16 %v1406_v31, %v1402_v30  ;;  %v4884_v30 = vpack.c.bf16 %v1431_v20, %v1427_v18  ;;  %v4886_v31 = vpack.c.bf16 %v1438_v25, %v1434_v21 }
  0xcb   :  { %3499 = vmatpush1.bf16.msra.mxu1 %v4551_v40  ;;  %3484 = vmatprep.subr.msk.bf16.mxu0 %vm4557_vm2, %v4553_v41  ;;  %v4841_v40 = vpack.c.bf16 %v1408_v33, %v1404_v32  ;;  %v1407_v41 = vld [vmem:[#allocation6 + $0xf0] sm:$0xff]  ;;  %v1433_v32 = vld [vmem:[#allocation6 + $0x1c0] sm:$0xff] }
  0xcc   :  { %3502 = vmatprep.subr.msk.bf16.mxu1 %vm4557_vm2, %v4561_v46  ;;  %v4844_v46 = vpack.c.bf16 %v1405_v38, %v1401_v37  ;;  %v4848_v47 = vpack.c.bf16 %v1407_v41, %v1403_v39  ;;  %v1437_v33 = vld [vmem:[#allocation6 + $0x1e0] sm:$0xff]  ;;  %v4889_v37 = vpack.c.bf16 %v1440_v27, %v1436_v26  ;;  %v1435_v38 = vld [vmem:[#allocation6 + $0x1d0] sm:$0xff] }
  0xcd   :  { %v1439_v39 = vld [vmem:[#allocation6 + $0x1f0] sm:$0xff]  ;;  %v4892_v41 = vpack.c.bf16 %v1437_v33, %v1433_v32 }
  0xce   :  { %3487 = vmatpush1.bf16.msk.msra.mxu0 %vm4557_vm2, %v4564_v49  ;;  %v1409_v49 = vld [vmem:[#allocation6 + $0x100] sm:$0xff]  ;;  %v4896_v42 = vpack.c.bf16 %v1439_v39, %v1435_v38 }
  0xcf   :  { %3505 = vmatpush1.bf16.msk.msra.mxu1 %vm4557_vm2, %v4570_v50  ;;  %3507 = vmatprep.subr.bf16.mxu0 %v4789_v62  ;;  %v1413_v50 = vld [vmem:[#allocation6 + $0x120] sm:$0xff] }
  0xd0   :  { %3539 = vmatprep.subr.bf16.mxu1 %v4794_v3  ;;  %v4856_v58 = vpack.c.bf16 %v1413_v50, %v1409_v49  ;;  %v127_v49 = vld [vmem:[%s5248_s3] sm:$0xf]  ;;  %v135_v50 = vsub.s32 1, %v4939_v44 }
  0xd1   :  { %3152 = vmatmul.mubr.msk.f32.vlgmr.msra.gmra.mrb[14].mxu0 %vm150_vm3, %v3149_v9  ;;  %v4948_v51 = vrot.slane %v127_v49, %v131_v45  ;;  %v4957_v6 = vrot.slane %v127_v49, %v143_v55  ;;  %v4961_v15 = vrot.slane %v127_v49, %v139_v7  ;;  %v3181_v44 = vld [vmem:[%s5253_s8] ss:$0 sm:$0xff] }
  0xd2   :  { %3155 = vmatmul.mubr.msk.f32.vlgmr.msra.gmra.mrb[14].mxu1 %vm150_vm3, %v3149_v9  ;;  %3509 = vmatpush1.bf16.msra.mxu0 %v4802_v10  ;;  %v4868_v9 = vpack.c.bf16 %v1421_v63, %v1417_v61  ;;  %v4952_v53 = vrot.slane %v127_v49, %v135_v50 }
  0xd3   :  { %3541 = vmatpush1.bf16.msra.mxu1 %v4808_v11  ;;  %3511 = vmatprep.subr.bf16.mxu0 %v4810_v12 }
  0xd4   :  { %3543 = vmatprep.subr.bf16.mxu1 %v4813_v16  ;;  %1509 = vmatprep.mubr.f32.mxu0 %v4392_v1 }
  0xd5   :  { %1580 = vmatprep.mubr.f32.mxu1 %v4392_v1 }
  0xd6   :  { %3513 = vmatpush1.bf16.msra.mxu0 %v4818_v22 }
  0xd7   :  { %3545 = vmatpush1.bf16.msra.mxu1 %v4822_v23  ;;  %3515 = vmatprep.subr.bf16.mxu0 %v4824_v24 }
  0xd8   :  { %3547 = vmatprep.subr.bf16.mxu1 %v4827_v28 }
  0xda   :  { %3517 = vmatpush1.bf16.msra.mxu0 %v4832_v34 }
  0xdb   :  { %3549 = vmatpush1.bf16.msra.mxu1 %v4836_v35  ;;  %3519 = vmatprep.subr.bf16.mxu0 %v4838_v36 }
  0xdc   :  { %3551 = vmatprep.subr.bf16.mxu1 %v4841_v40 }
  0xde   :  { %3521 = vmatpush1.bf16.msra.mxu0 %v4844_v46 }
  0xdf   :  { %3553 = vmatpush1.bf16.msra.mxu1 %v4848_v47  ;;  %3523 = vmatprep.subr.bf16.mxu0 %v4850_v48 }
  0xe0   :  { %3555 = vmatprep.subr.bf16.mxu1 %v4853_v52 }
  0xe2   :  { %3525 = vmatpush1.bf16.msra.mxu0 %v4856_v58 }
  0xe3   :  { %3557 = vmatpush1.bf16.msra.mxu1 %v4860_v59  ;;  %3527 = vmatprep.subr.bf16.mxu0 %v4862_v60 }
  0xe4   :  { %3559 = vmatprep.subr.bf16.mxu1 %v4865_v2 }
  0xe6   :  { %3529 = vmatpush1.bf16.msra.mxu0 %v4868_v9 }
  0xe7   :  { %3561 = vmatpush1.bf16.msra.mxu1 %v4872_v13  ;;  %3531 = vmatprep.subr.bf16.mxu0 %v4874_v14 }
  0xe8   :  { %3563 = vmatprep.subr.bf16.mxu1 %v4877_v19 }
  0xea   :  { %3533 = vmatpush1.bf16.msra.mxu0 %v4880_v29 }
  0xeb   :  { %3565 = vmatpush1.bf16.msra.mxu1 %v4884_v30  ;;  %3535 = vmatprep.subr.bf16.mxu0 %v4886_v31 }
  0xec   :  { %3567 = vmatprep.subr.bf16.mxu1 %v4889_v37 }
  0xee   :  { %3537 = vmatpush1.bf16.msra.mxu0 %v4892_v41 }
  0xef   :  { %3569 = vmatpush1.bf16.msra.mxu1 %v4896_v42  ;;  %3571 = vmatprep.subr.bf16.mxu0 %v4789_v62 }
  0xf0   :  { %3603 = vmatprep.subr.bf16.mxu1 %v4794_v3 }
  0xf1   :  { %1510 = vmatmul.mubr.f32.vlgmr.msra.gmra.mrb[0].mxu0 %v4392_v1 }
  0xf2   :  { %1581 = vmatmul.mubr.f32.vlgmr.msra.gmra.mrb[0].mxu1 %v4392_v1  ;;  %3573 = vmatpush1.bf16.msra.mxu0 %v4802_v10 }
  0xf3   :  { %3605 = vmatpush1.bf16.msra.mxu1 %v4808_v11  ;;  %3575 = vmatprep.subr.bf16.mxu0 %v4810_v12 }
  0xf4   :  { %3607 = vmatprep.subr.bf16.mxu1 %v4813_v16  ;;  %1683 = vmatprep.mubr.f32.mxu0 %v4392_v1 }
  0xf5   :  { %1754 = vmatprep.mubr.f32.mxu1 %v4392_v1 }
  0xf6   :  { %3577 = vmatpush1.bf16.msra.mxu0 %v4818_v22 }
  0xf7   :  { %3609 = vmatpush1.bf16.msra.mxu1 %v4822_v23  ;;  %3579 = vmatprep.subr.bf16.mxu0 %v4824_v24 }
  0xf8   :  { %3611 = vmatprep.subr.bf16.mxu1 %v4827_v28 }
  0xfa   :  { %3581 = vmatpush1.bf16.msra.mxu0 %v4832_v34 }
  0xfb   :  { %3613 = vmatpush1.bf16.msra.mxu1 %v4836_v35  ;;  %3583 = vmatprep.subr.bf16.mxu0 %v4838_v36 }
  0xfc   :  { %3615 = vmatprep.subr.bf16.mxu1 %v4841_v40 }
  0xfe   :  { %3585 = vmatpush1.bf16.msra.mxu0 %v4844_v46 }
  0xff   :  { %3617 = vmatpush1.bf16.msra.mxu1 %v4848_v47  ;;  %3587 = vmatprep.subr.bf16.mxu0 %v4850_v48 }
 0x100   :  { %3619 = vmatprep.subr.bf16.mxu1 %v4853_v52 }
 0x102   :  { %3589 = vmatpush1.bf16.msra.mxu0 %v4856_v58 }
 0x103   :  { %3621 = vmatpush1.bf16.msra.mxu1 %v4860_v59  ;;  %3591 = vmatprep.subr.bf16.mxu0 %v4862_v60 }
 0x104   :  { %3623 = vmatprep.subr.bf16.mxu1 %v4865_v2 }
 0x106   :  { %3593 = vmatpush1.bf16.msra.mxu0 %v4868_v9 }
 0x107   :  { %3625 = vmatpush1.bf16.msra.mxu1 %v4872_v13  ;;  %3595 = vmatprep.subr.bf16.mxu0 %v4874_v14 }
 0x108   :  { %3627 = vmatprep.subr.bf16.mxu1 %v4877_v19 }
 0x10a   :  { %3597 = vmatpush1.bf16.msra.mxu0 %v4880_v29 }
 0x10b   :  { %3629 = vmatpush1.bf16.msra.mxu1 %v4884_v30  ;;  %3599 = vmatprep.subr.bf16.mxu0 %v4886_v31 }
 0x10c   :  { %3631 = vmatprep.subr.bf16.mxu1 %v4889_v37 }
 0x10e   :  { %3601 = vmatpush1.bf16.msra.mxu0 %v4892_v41 }
 0x10f   :  { %3633 = vmatpush1.bf16.msra.mxu1 %v4896_v42  ;;  %3635 = vmatprep.subr.bf16.mxu0 %v4789_v62 }
 0x110   :  { %3667 = vmatprep.subr.bf16.mxu1 %v4794_v3 }
 0x1c4   :  { %v1511_v54 = vpop.f32.mrb[0].mxu0 }
 0x1c5   :  { %v4082_v56 = vadd.f32 %v1511_v54, %v4948_v51  ;;  %v1582_v57 = vpop.f32.mrb[0].mxu1  ;;  %v1513_v61 = vpop.f32.mrb[1].mxu0 }
 0x1c6   :  { %v4083_v63 = vadd.f32 %v1513_v61, %v4952_v53  ;;  %v1584_v0 = vpop.f32.mrb[1].mxu1  ;;  %v4084_v18 = vadd.f32 %v1582_v57, %v4961_v15 }
 0x1c7   :  { %v3156_v4 = vmul.f32 -1.442695, %v4082_v56  ;;  %v4085_v8 = vadd.f32 %v1584_v0, %v4957_v6 }
 0x1c8   :  { %v3157_v5 = vmul.f32 -1.442695, %v4083_v63 }
 0x1c9   :  { %4160 = vpow2.f32 %v3156_v4  ;;  %v3158_v17 = vmul.f32 -1.442695, %v4085_v8 }
 0x1ca   :  { %4162 = vpow2.f32 %v3157_v5 }
 0x1cb   :  { %4164 = vpow2.f32 %v3158_v17 }
 0x1cc   :  { %4166 = vtanh.f32 %v4084_v18 }
 0x1d3   :  { %v4161_v20 = vpop.eup %4160 }
 0x1d4   :  { %v4163_v21 = vpop.eup %4162  ;;  %v1594_v25 = vadd.f32 1.0, %v4161_v20 }
 0x1d5   :  { %v1600_v26 = vadd.f32 1.0, %v4163_v21  ;;  %v4165_v27 = vpop.eup %4164 }
 0x1d6   :  { %4168 = vrcp.f32 %v1594_v25  ;;  %v4167_v32 = vpop.eup %4166  ;;  %v1607_v43 = vadd.f32 1.0, %v4165_v27 }
 0x1d7   :  { %4170 = vrcp.f32 %v1600_v26 }
 0x1d8   :  { %4172 = vrcp.f32 %v1607_v43 }
 0x1e0   :  { %v4169_v33 = vpop.eup %4168 }
 0x1e1   :  { %v4171_v38 = vpop.eup %4170  ;;  %v1611_v39 = vmul.f32 %v4169_v33, %v4167_v32 }
 0x1e2   :  { %v1610_v54 = vmul.f32 0.0, %v4171_v38  ;;  %v4173_v55 = vpop.eup %4172 }
 0x1e4   :  { %v4964_v49 = vadd.f32 %v1611_v39, %v1610_v54 }
 0x1e6   :  { %4174 = vtanh.f32 %v4964_v49 }
 0x1f0   :  { %v4175_v56 = vpop.eup %4174 }
 0x1f1   :  { %v1614_v57 = vmul.f32 %v4175_v56, %v4173_v55 }
 0x1f3   :  { %1684 = vmatmul.mubr.f32.vlgmr.msra.gmra.mrb[2].mxu0 %v1614_v57  ;;  %1755 = vmatmul.mubr.f32.vlgmr.msra.gmra.mrb[2].mxu1 %v1614_v57 }
 0x1f4   :  { %3637 = vmatpush1.bf16.msra.mxu0 %v4802_v10  ;;  %3669 = vmatpush1.bf16.msra.mxu1 %v4808_v11 }
 0x1f5   :  { %3639 = vmatprep.subr.bf16.mxu0 %v4810_v12  ;;  %3671 = vmatprep.subr.bf16.mxu1 %v4813_v16 }
 0x1f6   :  { %1857 = vmatprep.mubr.f32.mxu0 %v4392_v1  ;;  %1928 = vmatprep.mubr.f32.mxu1 %v4392_v1 }
 0x1f8   :  { %3641 = vmatpush1.bf16.msra.mxu0 %v4818_v22  ;;  %3673 = vmatpush1.bf16.msra.mxu1 %v4822_v23 }
 0x1f9   :  { %3643 = vmatprep.subr.bf16.mxu0 %v4824_v24  ;;  %3675 = vmatprep.subr.bf16.mxu1 %v4827_v28 }
 0x1fc   :  { %3645 = vmatpush1.bf16.msra.mxu0 %v4832_v34  ;;  %3677 = vmatpush1.bf16.msra.mxu1 %v4836_v35 }
 0x1fd   :  { %3647 = vmatprep.subr.bf16.mxu0 %v4838_v36  ;;  %3679 = vmatprep.subr.bf16.mxu1 %v4841_v40 }
 0x200   :  { %3649 = vmatpush1.bf16.msra.mxu0 %v4844_v46  ;;  %3681 = vmatpush1.bf16.msra.mxu1 %v4848_v47 }
 0x201   :  { %3651 = vmatprep.subr.bf16.mxu0 %v4850_v48  ;;  %3683 = vmatprep.subr.bf16.mxu1 %v4853_v52 }
 0x204   :  { %3653 = vmatpush1.bf16.msra.mxu0 %v4856_v58  ;;  %3685 = vmatpush1.bf16.msra.mxu1 %v4860_v59 }
 0x205   :  { %3655 = vmatprep.subr.bf16.mxu0 %v4862_v60  ;;  %3687 = vmatprep.subr.bf16.mxu1 %v4865_v2 }
 0x208   :  { %3657 = vmatpush1.bf16.msra.mxu0 %v4868_v9  ;;  %3689 = vmatpush1.bf16.msra.mxu1 %v4872_v13 }
 0x209   :  { %3659 = vmatprep.subr.bf16.mxu0 %v4874_v14  ;;  %3691 = vmatprep.subr.bf16.mxu1 %v4877_v19 }
 0x20c   :  { %3661 = vmatpush1.bf16.msra.mxu0 %v4880_v29  ;;  %3693 = vmatpush1.bf16.msra.mxu1 %v4884_v30 }
 0x20d   :  { %3663 = vmatprep.subr.bf16.mxu0 %v4886_v31  ;;  %3695 = vmatprep.subr.bf16.mxu1 %v4889_v37 }
 0x210   :  { %3665 = vmatpush1.bf16.msra.mxu0 %v4892_v41  ;;  %3697 = vmatpush1.bf16.msra.mxu1 %v4896_v42 }
 0x211   :  { %3699 = vmatprep.subr.bf16.mxu0 %v4789_v62  ;;  %3731 = vmatprep.subr.bf16.mxu1 %v4794_v3 }
 0x2c6   :  { %v1685_v61 = vpop.f32.mrb[2].mxu0  ;;  %v1756_v63 = vpop.f32.mrb[2].mxu1 }
 0x2c7   :  { %v4086_v0 = vadd.f32 %v1685_v61, %v4948_v51  ;;  %v1687_v4 = vpop.f32.mrb[3].mxu0  ;;  %v1758_v5 = vpop.f32.mrb[3].mxu1  ;;  %v4088_v21 = vadd.f32 %v1756_v63, %v4961_v15 }
 0x2c8   :  { %v4087_v7 = vadd.f32 %v1687_v4, %v4952_v53  ;;  %v4089_v18 = vadd.f32 %v1758_v5, %v4957_v6 }
 0x2c9   :  { %v3159_v8 = vmul.f32 -1.442695, %v4086_v0 }
 0x2ca   :  { %v3160_v17 = vmul.f32 -1.442695, %v4087_v7  ;;  %v3161_v20 = vmul.f32 -1.442695, %v4089_v18 }
 0x2cb   :  { %4176 = vpow2.f32 %v3159_v8 }
 0x2cc   :  { %4178 = vpow2.f32 %v3160_v17 }
 0x2cd   :  { %4180 = vpow2.f32 %v3161_v20 }
 0x2ce   :  { %4182 = vtanh.f32 %v4088_v21 }
 0x2d5   :  { %v4177_v25 = vpop.eup %4176 }
 0x2d6   :  { %v4179_v26 = vpop.eup %4178  ;;  %v1768_v27 = vadd.f32 1.0, %v4177_v25 }
 0x2d7   :  { %v1774_v32 = vadd.f32 1.0, %v4179_v26  ;;  %v4181_v33 = vpop.eup %4180 }
 0x2d8   :  { %4184 = vrcp.f32 %v1768_v27  ;;  %v4183_v38 = vpop.eup %4182  ;;  %v1781_v55 = vadd.f32 1.0, %v4181_v33 }
 0x2d9   :  { %4186 = vrcp.f32 %v1774_v32 }
 0x2da   :  { %4188 = vrcp.f32 %v1781_v55 }
 0x2e2   :  { %v4185_v39 = vpop.eup %4184 }
 0x2e3   :  { %v4187_v43 = vpop.eup %4186  ;;  %v1785_v54 = vmul.f32 %v4185_v39, %v4183_v38 }
 0x2e4   :  { %v1784_v56 = vmul.f32 %v4187_v43, %v4964_v49  ;;  %v4189_v61 = vpop.eup %4188 }
 0x2e6   :  { %v5006_v57 = vadd.f32 %v1785_v54, %v1784_v56 }
 0x2e8   :  { %4190 = vtanh.f32 %v5006_v57 }
 0x2f2   :  { %v4191_v63 = vpop.eup %4190 }
 0x2f3   :  { %v1788_v0 = vmul.f32 %v4191_v63, %v4189_v61 }
 0x2f5   :  { %1858 = vmatmul.mubr.f32.vlgmr.msra.gmra.mrb[4].mxu0 %v1788_v0  ;;  %1929 = vmatmul.mubr.f32.vlgmr.msra.gmra.mrb[4].mxu1 %v1788_v0 }
 0x2f6   :  { %3701 = vmatpush1.bf16.msra.mxu0 %v4802_v10  ;;  %3733 = vmatpush1.bf16.msra.mxu1 %v4808_v11 }
 0x2f7   :  { %3703 = vmatprep.subr.bf16.mxu0 %v4810_v12  ;;  %3735 = vmatprep.subr.bf16.mxu1 %v4813_v16 }
 0x2f8   :  { %2031 = vmatprep.mubr.f32.mxu0 %v4392_v1  ;;  %2102 = vmatprep.mubr.f32.mxu1 %v4392_v1 }
 0x2fa   :  { %3705 = vmatpush1.bf16.msra.mxu0 %v4818_v22  ;;  %3737 = vmatpush1.bf16.msra.mxu1 %v4822_v23 }
 0x2fb   :  { %3707 = vmatprep.subr.bf16.mxu0 %v4824_v24  ;;  %3739 = vmatprep.subr.bf16.mxu1 %v4827_v28 }
 0x2fe   :  { %3709 = vmatpush1.bf16.msra.mxu0 %v4832_v34  ;;  %3741 = vmatpush1.bf16.msra.mxu1 %v4836_v35 }
 0x2ff   :  { %3711 = vmatprep.subr.bf16.mxu0 %v4838_v36  ;;  %3743 = vmatprep.subr.bf16.mxu1 %v4841_v40 }
 0x302   :  { %3713 = vmatpush1.bf16.msra.mxu0 %v4844_v46  ;;  %3745 = vmatpush1.bf16.msra.mxu1 %v4848_v47 }
 0x303   :  { %3715 = vmatprep.subr.bf16.mxu0 %v4850_v48  ;;  %3747 = vmatprep.subr.bf16.mxu1 %v4853_v52 }
 0x306   :  { %3717 = vmatpush1.bf16.msra.mxu0 %v4856_v58  ;;  %3749 = vmatpush1.bf16.msra.mxu1 %v4860_v59 }
 0x307   :  { %3719 = vmatprep.subr.bf16.mxu0 %v4862_v60  ;;  %3751 = vmatprep.subr.bf16.mxu1 %v4865_v2 }
 0x30a   :  { %3721 = vmatpush1.bf16.msra.mxu0 %v4868_v9  ;;  %3753 = vmatpush1.bf16.msra.mxu1 %v4872_v13 }
 0x30b   :  { %3723 = vmatprep.subr.bf16.mxu0 %v4874_v14  ;;  %3755 = vmatprep.subr.bf16.mxu1 %v4877_v19 }
 0x30e   :  { %3725 = vmatpush1.bf16.msra.mxu0 %v4880_v29  ;;  %3757 = vmatpush1.bf16.msra.mxu1 %v4884_v30 }
 0x30f   :  { %3727 = vmatprep.subr.bf16.mxu0 %v4886_v31  ;;  %3759 = vmatprep.subr.bf16.mxu1 %v4889_v37 }
 0x312   :  { %3729 = vmatpush1.bf16.msra.mxu0 %v4892_v41  ;;  %3761 = vmatpush1.bf16.msra.mxu1 %v4896_v42 }
 0x313   :  { %3763 = vmatprep.subr.bf16.mxu0 %v4789_v62  ;;  %3795 = vmatprep.subr.bf16.mxu1 %v4794_v3 }
 0x3c8   :  { %v1859_v49 = vpop.f32.mrb[4].mxu0  ;;  %v1930_v4 = vpop.f32.mrb[4].mxu1 }
 0x3c9   :  { %v4090_v5 = vadd.f32 %v1859_v49, %v4948_v51  ;;  %v1861_v7 = vpop.f32.mrb[5].mxu0  ;;  %v1932_v8 = vpop.f32.mrb[5].mxu1  ;;  %v4092_v26 = vadd.f32 %v1930_v4, %v4961_v15 }
 0x3ca   :  { %v4091_v17 = vadd.f32 %v1861_v7, %v4952_v53  ;;  %v4093_v21 = vadd.f32 %v1932_v8, %v4957_v6 }
 0x3cb   :  { %v3162_v18 = vmul.f32 -1.442695, %v4090_v5 }
 0x3cc   :  { %v3163_v20 = vmul.f32 -1.442695, %v4091_v17  ;;  %v3164_v25 = vmul.f32 -1.442695, %v4093_v21 }
 0x3cd   :  { %4192 = vpow2.f32 %v3162_v18 }
 0x3ce   :  { %4194 = vpow2.f32 %v3163_v20 }
 0x3cf   :  { %4196 = vpow2.f32 %v3164_v25 }
 0x3d0   :  { %4198 = vtanh.f32 %v4092_v26 }
 0x3d7   :  { %v4193_v27 = vpop.eup %4192 }
 0x3d8   :  { %v4195_v32 = vpop.eup %4194  ;;  %v1942_v33 = vadd.f32 1.0, %v4193_v27 }
 0x3d9   :  { %v1948_v38 = vadd.f32 1.0, %v4195_v32  ;;  %v4197_v39 = vpop.eup %4196 }
 0x3da   :  { %4200 = vrcp.f32 %v1942_v33  ;;  %v4199_v43 = vpop.eup %4198  ;;  %v1955_v61 = vadd.f32 1.0, %v4197_v39 }
 0x3db   :  { %4202 = vrcp.f32 %v1948_v38 }
 0x3dc   :  { %4204 = vrcp.f32 %v1955_v61 }
 0x3e4   :  { %v4201_v54 = vpop.eup %4200 }
 0x3e5   :  { %v4203_v55 = vpop.eup %4202  ;;  %v1959_v56 = vmul.f32 %v4201_v54, %v4199_v43 }
 0x3e6   :  { %v1958_v63 = vmul.f32 %v4203_v55, %v5006_v57  ;;  %v4205_v49 = vpop.eup %4204 }
 0x3e8   :  { %v5048_v0 = vadd.f32 %v1959_v56, %v1958_v63 }
 0x3ea   :  { %4206 = vtanh.f32 %v5048_v0 }
 0x3f4   :  { %v4207_v4 = vpop.eup %4206 }
 0x3f5   :  { %v1962_v5 = vmul.f32 %v4207_v4, %v4205_v49 }
 0x3f7   :  { %2032 = vmatmul.mubr.f32.vlgmr.msra.gmra.mrb[6].mxu0 %v1962_v5  ;;  %2103 = vmatmul.mubr.f32.vlgmr.msra.gmra.mrb[6].mxu1 %v1962_v5 }
 0x3f8   :  { %3765 = vmatpush1.bf16.msra.mxu0 %v4802_v10  ;;  %3797 = vmatpush1.bf16.msra.mxu1 %v4808_v11 }
 0x3f9   :  { %3767 = vmatprep.subr.bf16.mxu0 %v4810_v12  ;;  %3799 = vmatprep.subr.bf16.mxu1 %v4813_v16 }
 0x3fa   :  { %2205 = vmatprep.mubr.f32.mxu0 %v4392_v1  ;;  %2276 = vmatprep.mubr.f32.mxu1 %v4392_v1 }
 0x3fc   :  { %3769 = vmatpush1.bf16.msra.mxu0 %v4818_v22  ;;  %3801 = vmatpush1.bf16.msra.mxu1 %v4822_v23 }
 0x3fd   :  { %3771 = vmatprep.subr.bf16.mxu0 %v4824_v24  ;;  %3803 = vmatprep.subr.bf16.mxu1 %v4827_v28 }
 0x400   :  { %3773 = vmatpush1.bf16.msra.mxu0 %v4832_v34  ;;  %3805 = vmatpush1.bf16.msra.mxu1 %v4836_v35 }
 0x401   :  { %3775 = vmatprep.subr.bf16.mxu0 %v4838_v36  ;;  %3807 = vmatprep.subr.bf16.mxu1 %v4841_v40 }
 0x404   :  { %3777 = vmatpush1.bf16.msra.mxu0 %v4844_v46  ;;  %3809 = vmatpush1.bf16.msra.mxu1 %v4848_v47 }
 0x405   :  { %3779 = vmatprep.subr.bf16.mxu0 %v4850_v48  ;;  %3811 = vmatprep.subr.bf16.mxu1 %v4853_v52 }
 0x408   :  { %3781 = vmatpush1.bf16.msra.mxu0 %v4856_v58  ;;  %3813 = vmatpush1.bf16.msra.mxu1 %v4860_v59 }
 0x409   :  { %3783 = vmatprep.subr.bf16.mxu0 %v4862_v60  ;;  %3815 = vmatprep.subr.bf16.mxu1 %v4865_v2 }
 0x40c   :  { %3785 = vmatpush1.bf16.msra.mxu0 %v4868_v9  ;;  %3817 = vmatpush1.bf16.msra.mxu1 %v4872_v13 }
 0x40d   :  { %3787 = vmatprep.subr.bf16.mxu0 %v4874_v14  ;;  %3819 = vmatprep.subr.bf16.mxu1 %v4877_v19 }
 0x410   :  { %3789 = vmatpush1.bf16.msra.mxu0 %v4880_v29  ;;  %3821 = vmatpush1.bf16.msra.mxu1 %v4884_v30 }
 0x411   :  { %3791 = vmatprep.subr.bf16.mxu0 %v4886_v31  ;;  %3823 = vmatprep.subr.bf16.mxu1 %v4889_v37 }
 0x414   :  { %3793 = vmatpush1.bf16.msra.mxu0 %v4892_v41  ;;  %3825 = vmatpush1.bf16.msra.mxu1 %v4896_v42 }
 0x415   :  { %3827 = vmatprep.subr.bf16.mxu0 %v4789_v62  ;;  %3859 = vmatprep.subr.bf16.mxu1 %v4794_v3 }
 0x4ca   :  { %v2033_v57 = vpop.f32.mrb[6].mxu0  ;;  %v2104_v7 = vpop.f32.mrb[6].mxu1 }
 0x4cb   :  { %v4094_v8 = vadd.f32 %v2033_v57, %v4948_v51  ;;  %v2035_v17 = vpop.f32.mrb[7].mxu0  ;;  %v2106_v18 = vpop.f32.mrb[7].mxu1  ;;  %v4096_v32 = vadd.f32 %v2104_v7, %v4961_v15 }
 0x4cc   :  { %v4095_v20 = vadd.f32 %v2035_v17, %v4952_v53  ;;  %v4097_v26 = vadd.f32 %v2106_v18, %v4957_v6 }
 0x4cd   :  { %v3165_v21 = vmul.f32 -1.442695, %v4094_v8 }
 0x4ce   :  { %v3166_v25 = vmul.f32 -1.442695, %v4095_v20  ;;  %v3167_v27 = vmul.f32 -1.442695, %v4097_v26 }
 0x4cf   :  { %4208 = vpow2.f32 %v3165_v21 }
 0x4d0   :  { %4210 = vpow2.f32 %v3166_v25 }
 0x4d1   :  { %4212 = vpow2.f32 %v3167_v27 }
 0x4d2   :  { %4214 = vtanh.f32 %v4096_v32 }
 0x4d9   :  { %v4209_v33 = vpop.eup %4208 }
 0x4da   :  { %v4211_v38 = vpop.eup %4210  ;;  %v2116_v39 = vadd.f32 1.0, %v4209_v33 }
 0x4db   :  { %v2122_v43 = vadd.f32 1.0, %v4211_v38  ;;  %v4213_v54 = vpop.eup %4212 }
 0x4dc   :  { %4216 = vrcp.f32 %v2116_v39  ;;  %v4215_v55 = vpop.eup %4214  ;;  %v2129_v49 = vadd.f32 1.0, %v4213_v54 }
 0x4dd   :  { %4218 = vrcp.f32 %v2122_v43 }
 0x4de   :  { %4220 = vrcp.f32 %v2129_v49 }
 0x4e6   :  { %v4217_v56 = vpop.eup %4216 }
 0x4e7   :  { %v4219_v61 = vpop.eup %4218  ;;  %v2133_v63 = vmul.f32 %v4217_v56, %v4215_v55 }
 0x4e8   :  { %v2132_v4 = vmul.f32 %v4219_v61, %v5048_v0  ;;  %v4221_v57 = vpop.eup %4220 }
 0x4ea   :  { %v5090_v5 = vadd.f32 %v2133_v63, %v2132_v4 }
 0x4ec   :  { %4222 = vtanh.f32 %v5090_v5 }
 0x4f6   :  { %v4223_v7 = vpop.eup %4222 }
 0x4f7   :  { %v2136_v8 = vmul.f32 %v4223_v7, %v4221_v57 }
 0x4f9   :  { %2206 = vmatmul.mubr.f32.vlgmr.msra.gmra.mrb[8].mxu0 %v2136_v8  ;;  %2277 = vmatmul.mubr.f32.vlgmr.msra.gmra.mrb[8].mxu1 %v2136_v8 }
 0x4fa   :  { %3829 = vmatpush1.bf16.msra.mxu0 %v4802_v10  ;;  %3861 = vmatpush1.bf16.msra.mxu1 %v4808_v11 }
 0x4fb   :  { %3831 = vmatprep.subr.bf16.mxu0 %v4810_v12  ;;  %3863 = vmatprep.subr.bf16.mxu1 %v4813_v16 }
 0x4fc   :  { %2379 = vmatprep.mubr.f32.mxu0 %v4392_v1  ;;  %2450 = vmatprep.mubr.f32.mxu1 %v4392_v1 }
 0x4fe   :  { %3833 = vmatpush1.bf16.msra.mxu0 %v4818_v22  ;;  %3865 = vmatpush1.bf16.msra.mxu1 %v4822_v23 }
 0x4ff   :  { %3835 = vmatprep.subr.bf16.mxu0 %v4824_v24  ;;  %3867 = vmatprep.subr.bf16.mxu1 %v4827_v28 }
 0x502   :  { %3837 = vmatpush1.bf16.msra.mxu0 %v4832_v34  ;;  %3869 = vmatpush1.bf16.msra.mxu1 %v4836_v35 }
 0x503   :  { %3839 = vmatprep.subr.bf16.mxu0 %v4838_v36  ;;  %3871 = vmatprep.subr.bf16.mxu1 %v4841_v40 }
 0x506   :  { %3841 = vmatpush1.bf16.msra.mxu0 %v4844_v46  ;;  %3873 = vmatpush1.bf16.msra.mxu1 %v4848_v47 }
 0x507   :  { %3843 = vmatprep.subr.bf16.mxu0 %v4850_v48  ;;  %3875 = vmatprep.subr.bf16.mxu1 %v4853_v52 }
 0x50a   :  { %3845 = vmatpush1.bf16.msra.mxu0 %v4856_v58  ;;  %3877 = vmatpush1.bf16.msra.mxu1 %v4860_v59 }
 0x50b   :  { %3847 = vmatprep.subr.bf16.mxu0 %v4862_v60  ;;  %3879 = vmatprep.subr.bf16.mxu1 %v4865_v2 }
 0x50e   :  { %3849 = vmatpush1.bf16.msra.mxu0 %v4868_v9  ;;  %3881 = vmatpush1.bf16.msra.mxu1 %v4872_v13 }
 0x50f   :  { %3851 = vmatprep.subr.bf16.mxu0 %v4874_v14  ;;  %3883 = vmatprep.subr.bf16.mxu1 %v4877_v19 }
 0x512   :  { %3853 = vmatpush1.bf16.msra.mxu0 %v4880_v29  ;;  %3885 = vmatpush1.bf16.msra.mxu1 %v4884_v30 }
 0x513   :  { %3855 = vmatprep.subr.bf16.mxu0 %v4886_v31  ;;  %3887 = vmatprep.subr.bf16.mxu1 %v4889_v37 }
 0x516   :  { %3857 = vmatpush1.bf16.msra.mxu0 %v4892_v41  ;;  %3889 = vmatpush1.bf16.msra.mxu1 %v4896_v42 }
 0x517   :  { %3891 = vmatprep.subr.bf16.mxu0 %v4789_v62  ;;  %3923 = vmatprep.subr.bf16.mxu1 %v4794_v3 }
 0x5cc   :  { %v2207_v0 = vpop.f32.mrb[8].mxu0  ;;  %v2278_v17 = vpop.f32.mrb[8].mxu1 }
 0x5cd   :  { %v4098_v18 = vadd.f32 %v2207_v0, %v4948_v51  ;;  %v2209_v20 = vpop.f32.mrb[9].mxu0  ;;  %v2280_v21 = vpop.f32.mrb[9].mxu1  ;;  %v4100_v38 = vadd.f32 %v2278_v17, %v4961_v15 }
 0x5ce   :  { %v4099_v25 = vadd.f32 %v2209_v20, %v4952_v53  ;;  %v4101_v32 = vadd.f32 %v2280_v21, %v4957_v6 }
 0x5cf   :  { %v3168_v26 = vmul.f32 -1.442695, %v4098_v18 }
 0x5d0   :  { %v3169_v27 = vmul.f32 -1.442695, %v4099_v25  ;;  %v3170_v33 = vmul.f32 -1.442695, %v4101_v32 }
 0x5d1   :  { %4224 = vpow2.f32 %v3168_v26 }
 0x5d2   :  { %4226 = vpow2.f32 %v3169_v27 }
 0x5d3   :  { %4228 = vpow2.f32 %v3170_v33 }
 0x5d4   :  { %4230 = vtanh.f32 %v4100_v38 }
 0x5db   :  { %v4225_v39 = vpop.eup %4224 }
 0x5dc   :  { %v4227_v43 = vpop.eup %4226  ;;  %v2290_v54 = vadd.f32 1.0, %v4225_v39 }
 0x5dd   :  { %v2296_v55 = vadd.f32 1.0, %v4227_v43  ;;  %v4229_v56 = vpop.eup %4228 }
 0x5de   :  { %4232 = vrcp.f32 %v2290_v54  ;;  %v4231_v61 = vpop.eup %4230  ;;  %v2303_v57 = vadd.f32 1.0, %v4229_v56 }
 0x5df   :  { %4234 = vrcp.f32 %v2296_v55 }
 0x5e0   :  { %4236 = vrcp.f32 %v2303_v57 }
 0x5e8   :  { %v4233_v63 = vpop.eup %4232 }
 0x5e9   :  { %v4235_v49 = vpop.eup %4234  ;;  %v2307_v4 = vmul.f32 %v4233_v63, %v4231_v61 }
 0x5ea   :  { %v2306_v7 = vmul.f32 %v4235_v49, %v5090_v5  ;;  %v4237_v0 = vpop.eup %4236 }
 0x5ec   :  { %v5132_v8 = vadd.f32 %v2307_v4, %v2306_v7 }
 0x5ee   :  { %4238 = vtanh.f32 %v5132_v8 }
 0x5f8   :  { %v4239_v17 = vpop.eup %4238 }
 0x5f9   :  { %v2310_v18 = vmul.f32 %v4239_v17, %v4237_v0 }
 0x5fb   :  { %2380 = vmatmul.mubr.f32.vlgmr.msra.gmra.mrb[10].mxu0 %v2310_v18  ;;  %2451 = vmatmul.mubr.f32.vlgmr.msra.gmra.mrb[10].mxu1 %v2310_v18 }
 0x5fc   :  { %3893 = vmatpush1.bf16.msra.mxu0 %v4802_v10  ;;  %3925 = vmatpush1.bf16.msra.mxu1 %v4808_v11 }
 0x5fd   :  { %3895 = vmatprep.subr.bf16.mxu0 %v4810_v12  ;;  %3927 = vmatprep.subr.bf16.mxu1 %v4813_v16 }
 0x5fe   :  { %2553 = vmatprep.mubr.f32.mxu0 %v4392_v1  ;;  %2624 = vmatprep.mubr.f32.mxu1 %v4392_v1 }
 0x600   :  { %3897 = vmatpush1.bf16.msra.mxu0 %v4818_v22  ;;  %3929 = vmatpush1.bf16.msra.mxu1 %v4822_v23 }
 0x601   :  { %3899 = vmatprep.subr.bf16.mxu0 %v4824_v24  ;;  %3931 = vmatprep.subr.bf16.mxu1 %v4827_v28 }
 0x604   :  { %3901 = vmatpush1.bf16.msra.mxu0 %v4832_v34  ;;  %3933 = vmatpush1.bf16.msra.mxu1 %v4836_v35 }
 0x605   :  { %3903 = vmatprep.subr.bf16.mxu0 %v4838_v36  ;;  %3935 = vmatprep.subr.bf16.mxu1 %v4841_v40 }
 0x608   :  { %3905 = vmatpush1.bf16.msra.mxu0 %v4844_v46  ;;  %3937 = vmatpush1.bf16.msra.mxu1 %v4848_v47 }
 0x609   :  { %3907 = vmatprep.subr.bf16.mxu0 %v4850_v48  ;;  %3939 = vmatprep.subr.bf16.mxu1 %v4853_v52 }
 0x60c   :  { %3909 = vmatpush1.bf16.msra.mxu0 %v4856_v58  ;;  %3941 = vmatpush1.bf16.msra.mxu1 %v4860_v59 }
 0x60d   :  { %3911 = vmatprep.subr.bf16.mxu0 %v4862_v60  ;;  %3943 = vmatprep.subr.bf16.mxu1 %v4865_v2 }
 0x610   :  { %3913 = vmatpush1.bf16.msra.mxu0 %v4868_v9  ;;  %3945 = vmatpush1.bf16.msra.mxu1 %v4872_v13 }
 0x611   :  { %3915 = vmatprep.subr.bf16.mxu0 %v4874_v14  ;;  %3947 = vmatprep.subr.bf16.mxu1 %v4877_v19 }
 0x614   :  { %3917 = vmatpush1.bf16.msra.mxu0 %v4880_v29  ;;  %3949 = vmatpush1.bf16.msra.mxu1 %v4884_v30 }
 0x615   :  { %3919 = vmatprep.subr.bf16.mxu0 %v4886_v31  ;;  %3951 = vmatprep.subr.bf16.mxu1 %v4889_v37 }
 0x618   :  { %3921 = vmatpush1.bf16.msra.mxu0 %v4892_v41  ;;  %3953 = vmatpush1.bf16.msra.mxu1 %v4896_v42 }
 0x619   :  { %3955 = vmatprep.subr.bf16.mxu0 %v4789_v62  ;;  %3987 = vmatprep.subr.bf16.mxu1 %v4794_v3 }
 0x6ce   :  { %v2381_v5 = vpop.f32.mrb[10].mxu0  ;;  %v2452_v20 = vpop.f32.mrb[10].mxu1 }
 0x6cf   :  { %v4102_v21 = vadd.f32 %v2381_v5, %v4948_v51  ;;  %v2383_v25 = vpop.f32.mrb[11].mxu0  ;;  %v2454_v26 = vpop.f32.mrb[11].mxu1  ;;  %v4104_v43 = vadd.f32 %v2452_v20, %v4961_v15 }
 0x6d0   :  { %v4103_v27 = vadd.f32 %v2383_v25, %v4952_v53  ;;  %v4105_v38 = vadd.f32 %v2454_v26, %v4957_v6  ;;  %v2840_v25 = vld [vmem:[#allocation8 + $0x38] sm:$0xff] }
 0x6d1   :  { %v3171_v32 = vmul.f32 -1.442695, %v4102_v21  ;;  %v2838_v21 = vld [vmem:[#allocation8 + $0x28] sm:$0xff] }
 0x6d2   :  { %v3172_v33 = vmul.f32 -1.442695, %v4103_v27  ;;  %v3173_v39 = vmul.f32 -1.442695, %v4105_v38  ;;  %v4022_v26 = vpack.c.bf16 %v2840_v25, %v2838_v21  ;;  %v2837_v27 = vld [vmem:[#allocation8 + $0x20] sm:$0xff]  ;;  %v2842_v38 = vld [vmem:[#allocation8 + $0x48] sm:$0xff] }
 0x6d3   :  { %4240 = vpow2.f32 %v3171_v32  ;;  %v2839_v32 = vld [vmem:[#allocation8 + $0x30] sm:$0xff]  ;;  %v2954_v25 = vld [vmem:[#allocation9 + $0x20] sm:$0xff] }
 0x6d4   :  { %4242 = vpow2.f32 %v3172_v33  ;;  %v4024_v33 = vpack.c.bf16 %v2839_v32, %v2837_v27  ;;  %v2972_v27 = vld [vmem:[#allocation9 + $0xb0] sm:$0xff]  ;;  %v2973_v32 = vld [vmem:[#allocation9 + $0xb8] sm:$0xff] }
 0x6d5   :  { %4244 = vpow2.f32 %v3173_v39  ;;  %v2844_v39 = vld [vmem:[#allocation8 + $0x58] sm:$0xff] }
 0x6d6   :  { %4246 = vtanh.f32 %v4104_v43  ;;  %v4026_v43 = vpack.c.bf16 %v2844_v39, %v2842_v38  ;;  %v4062_v38 = vpack.c.bf16 %v2973_v32, %v2972_v27  ;;  %v2956_v39 = vld [vmem:[#allocation9 + $0x30] sm:$0xff] }
 0x6dd   :  { %v4241_v62 = vpop.eup %4240 }
 0x6de   :  { %v4243_v54 = vpop.eup %4242  ;;  %v2464_v3 = vadd.f32 1.0, %v4241_v62  ;;  %v2843_v62 = vld [vmem:[#allocation8 + $0x50] sm:$0xff] }
 0x6df   :  { %v2470_v55 = vadd.f32 1.0, %v4243_v54  ;;  %v4245_v56 = vpop.eup %4244 }
 0x6e0   :  { %4248 = vrcp.f32 %v2464_v3  ;;  %v4247_v61 = vpop.eup %4246  ;;  %v2477_v57 = vadd.f32 1.0, %v4245_v56  ;;  %v2846_v3 = vld [vmem:[#allocation8 + $0x68] sm:$0xff] }
 0x6e1   :  { %4250 = vrcp.f32 %v2470_v55  ;;  %v2848_v55 = vld [vmem:[#allocation8 + $0x78] sm:$0xff] }
 0x6e2   :  { %4252 = vrcp.f32 %v2477_v57  ;;  %v4030_v56 = vpack.c.bf16 %v2848_v55, %v2846_v3  ;;  %v2852_v57 = vld [vmem:[#allocation8 + $0x98] sm:$0xff]  ;;  %v2958_v55 = vld [vmem:[#allocation9 + $0x40] sm:$0xff] }
 0x6ea   :  { %v4249_v63 = vpop.eup %4248 }
 0x6eb   :  { %v4251_v49 = vpop.eup %4250  ;;  %v2481_v4 = vmul.f32 %v4249_v63, %v4247_v61  ;;  %v2845_v61 = vld [vmem:[#allocation8 + $0x60] sm:$0xff]  ;;  %v2847_v63 = vld [vmem:[#allocation8 + $0x70] sm:$0xff] }
 0x6ec   :  { %v2480_v7 = vmul.f32 %v4251_v49, %v5132_v8  ;;  %v4253_v17 = vpop.eup %4252  ;;  %v2835_v8 = vld [vmem:[#allocation8 + $0x10] sm:$0xff]  ;;  %v4032_v49 = vpack.c.bf16 %v2847_v63, %v2845_v61  ;;  %v2977_v63 = vld [vmem:[#allocation9 + $0xd8] sm:$0xff] }
 0x6ed   :  { %v2976_v61 = vld [vmem:[#allocation9 + $0xd0] sm:$0xff] }
 0x6ee   :  { %v5174_v0 = vadd.f32 %v2481_v4, %v2480_v7  ;;  %v2850_v4 = vld [vmem:[#allocation8 + $0x88] sm:$0xff] }
 0x6ef   :  { %v4034_v7 = vpack.c.bf16 %v2852_v57, %v2850_v4  ;;  %v4070_v4 = vpack.c.bf16 %v2977_v63, %v2976_v61  ;;  %v2960_v57 = vld [vmem:[#allocation9 + $0x50] sm:$0xff] }
 0x6f0   :  { %4254 = vtanh.f32 %v5174_v0 }
 0x6fa   :  { %v4255_v18 = vpop.eup %4254 }
 0x6fb   :  { %v2484_v5 = vmul.f32 %v4255_v18, %v4253_v17  ;;  %v2851_v17 = vld [vmem:[#allocation8 + $0x90] sm:$0xff] }
 0x6fd   :  { %2554 = vmatmul.mubr.f32.vlgmr.msra.gmra.mrb[12].mxu0 %v2484_v5  ;;  %2625 = vmatmul.mubr.f32.vlgmr.msra.gmra.mrb[12].mxu1 %v2484_v5  ;;  %v2854_v5 = vld [vmem:[#allocation8 + $0xa8] sm:$0xff] }
 0x6fe   :  { %3957 = vmatpush1.bf16.msra.mxu0 %v4802_v10  ;;  %3989 = vmatpush1.bf16.msra.mxu1 %v4808_v11 }
 0x6ff   :  { %3959 = vmatprep.subr.bf16.mxu0 %v4810_v12  ;;  %3991 = vmatprep.subr.bf16.mxu1 %v4813_v16 }
 0x700   :  { %2727 = vmatprep.mubr.f32.mxu0 %v4392_v1  ;;  %2798 = vmatprep.mubr.f32.mxu1 %v4392_v1 }
 0x702   :  { %3961 = vmatpush1.bf16.msra.mxu0 %v4818_v22  ;;  %3993 = vmatpush1.bf16.msra.mxu1 %v4822_v23 }
 0x703   :  { %3963 = vmatprep.subr.bf16.mxu0 %v4824_v24  ;;  %3995 = vmatprep.subr.bf16.mxu1 %v4827_v28 }
 0x706   :  { %3965 = vmatpush1.bf16.msra.mxu0 %v4832_v34  ;;  %3997 = vmatpush1.bf16.msra.mxu1 %v4836_v35 }
 0x707   :  { %3967 = vmatprep.subr.bf16.mxu0 %v4838_v36  ;;  %3999 = vmatprep.subr.bf16.mxu1 %v4841_v40 }
 0x70a   :  { %3969 = vmatpush1.bf16.msra.mxu0 %v4844_v46  ;;  %4001 = vmatpush1.bf16.msra.mxu1 %v4848_v47 }
 0x70b   :  { %3971 = vmatprep.subr.bf16.mxu0 %v4850_v48  ;;  %4003 = vmatprep.subr.bf16.mxu1 %v4853_v52 }
 0x70e   :  { %3973 = vmatpush1.bf16.msra.mxu0 %v4856_v58  ;;  %4005 = vmatpush1.bf16.msra.mxu1 %v4860_v59 }
 0x70f   :  { %3975 = vmatprep.subr.bf16.mxu0 %v4862_v60  ;;  %4007 = vmatprep.subr.bf16.mxu1 %v4865_v2 }
 0x712   :  { %3977 = vmatpush1.bf16.msra.mxu0 %v4868_v9  ;;  %4009 = vmatpush1.bf16.msra.mxu1 %v4872_v13 }
 0x713   :  { %3979 = vmatprep.subr.bf16.mxu0 %v4874_v14  ;;  %4011 = vmatprep.subr.bf16.mxu1 %v4877_v19 }
 0x716   :  { %3981 = vmatpush1.bf16.msra.mxu0 %v4880_v29  ;;  %4013 = vmatpush1.bf16.msra.mxu1 %v4884_v30 }
 0x717   :  { %3983 = vmatprep.subr.bf16.mxu0 %v4886_v31  ;;  %4015 = vmatprep.subr.bf16.mxu1 %v4889_v37  ;;  %v2834_v31 = vld [vmem:[#allocation8 + $0x8] sm:$0xff]  ;;  %v2836_v37 = vld [vmem:[#allocation8 + $0x18] sm:$0xff] }
 0x71a   :  { %3985 = vmatpush1.bf16.msra.mxu0 %v4892_v41  ;;  %4017 = vmatpush1.bf16.msra.mxu1 %v4896_v42  ;;  %v4018_v41 = vpack.c.bf16 %v2836_v37, %v2834_v31  ;;  %v2833_v42 = vld [vmem:[#allocation8] sm:$0xff]  ;;  %v2952_v37 = vld [vmem:[#allocation9 + $0x10] sm:$0xff] }
 0x71b   :  { %v4020_v20 = vpack.c.bf16 %v2835_v8, %v2833_v42  ;;  %v2970_v42 = vld [vmem:[#allocation9 + $0xa0] sm:$0xff]  ;;  %v2971_v8 = vld [vmem:[#allocation9 + $0xa8] sm:$0xff] }
 0x71c   :  { %4019 = vmatprep.subr.bf16.mxu0 %v4018_v41  ;;  %v2953_v41 = vld [vmem:[#allocation9 + $0x18] sm:$0xff]  ;;  %v4058_v21 = vpack.c.bf16 %v2971_v8, %v2970_v42 }
 0x71d   :  { %v2965_v42 = vld [vmem:[#allocation9 + $0x78] sm:$0xff] }
 0x7d0   :  { %v2555_v10 = vpop.f32.mrb[12].mxu0  ;;  %v2626_v11 = vpop.f32.mrb[12].mxu1 }
 0x7d1   :  { %v4106_v12 = vadd.f32 %v2555_v10, %v4948_v51  ;;  %v2557_v16 = vpop.f32.mrb[13].mxu0  ;;  %v2628_v22 = vpop.f32.mrb[13].mxu1  ;;  %v4108_v36 = vadd.f32 %v2626_v11, %v4961_v15  ;;  %v2856_v10 = vld [vmem:[#allocation8 + $0xb8] sm:$0xff] }
 0x7d2   :  { %v4107_v23 = vadd.f32 %v2557_v16, %v4952_v53  ;;  %v4109_v34 = vadd.f32 %v2628_v22, %v4957_v6  ;;  %v4038_v11 = vpack.c.bf16 %v2856_v10, %v2854_v5  ;;  %v2855_v16 = vld [vmem:[#allocation8 + $0xb0] sm:$0xff]  ;;  %v2858_v22 = vld [vmem:[#allocation8 + $0xc8] sm:$0xff] }
 0x7d3   :  { %v3174_v24 = vmul.f32 -1.442695, %v4106_v12  ;;  %v2853_v12 = vld [vmem:[#allocation8 + $0xa0] sm:$0xff] }
 0x7d4   :  { %v3175_v28 = vmul.f32 -1.442695, %v4107_v23  ;;  %v3176_v35 = vmul.f32 -1.442695, %v4109_v34  ;;  %v4040_v23 = vpack.c.bf16 %v2855_v16, %v2853_v12  ;;  %v2859_v34 = vld [vmem:[#allocation8 + $0xd0] sm:$0xff] }
 0x7d5   :  { %4256 = vpow2.f32 %v3174_v24  ;;  %v2860_v24 = vld [vmem:[#allocation8 + $0xd8] sm:$0xff] }
 0x7d6   :  { %4258 = vpow2.f32 %v3175_v28  ;;  %v2857_v28 = vld [vmem:[#allocation8 + $0xc0] sm:$0xff] }
 0x7d7   :  { %4260 = vpow2.f32 %v3176_v35  ;;  %v4042_v35 = vpack.c.bf16 %v2860_v24, %v2858_v22 }
 0x7d8   :  { %4262 = vtanh.f32 %v4108_v36  ;;  %v2862_v36 = vld [vmem:[#allocation8 + $0xe8] sm:$0xff] }
 0x7df   :  { %v4257_v40 = vpop.eup %4256 }
 0x7e0   :  { %v4259_v46 = vpop.eup %4258  ;;  %v2638_v47 = vadd.f32 1.0, %v4257_v40  ;;  %v2864_v40 = vld [vmem:[#allocation8 + $0xf8] sm:$0xff] }
 0x7e1   :  { %v2644_v48 = vadd.f32 1.0, %v4259_v46  ;;  %v4261_v52 = vpop.eup %4260  ;;  %v4044_v46 = vpack.c.bf16 %v2859_v34, %v2857_v28 }
 0x7e2   :  { %4264 = vrcp.f32 %v2638_v47  ;;  %v4263_v58 = vpop.eup %4262  ;;  %v2651_v9 = vadd.f32 1.0, %v4261_v52  ;;  %v4046_v47 = vpack.c.bf16 %v2864_v40, %v2862_v36  ;;  %v2863_v52 = vld [vmem:[#allocation8 + $0xf0] sm:$0xff] }
 0x7e3   :  { %4266 = vrcp.f32 %v2644_v48  ;;  %v2861_v48 = vld [vmem:[#allocation8 + $0xe0] sm:$0xff] }
 0x7e4   :  { %4268 = vrcp.f32 %v2651_v9 }
 0x7ec   :  { %v4265_v59 = vpop.eup %4264 }
 0x7ed   :  { %v4267_v60 = vpop.eup %4266  ;;  %v2655_v2 = vmul.f32 %v4265_v59, %v4263_v58  ;;  %v4048_v58 = vpack.c.bf16 %v2863_v52, %v2861_v48  ;;  %v2966_v59 = vld [vmem:[#allocation9 + $0x80] sm:$0xff] }
 0x7ee   :  { %v2654_v13 = vmul.f32 %v4267_v60, %v5174_v0  ;;  %v4269_v19 = vpop.eup %4268  ;;  %v2849_v0 = vld [vmem:[#allocation8 + $0x80] sm:$0xff]  ;;  %v2967_v60 = vld [vmem:[#allocation9 + $0x88] sm:$0xff] }
 0x7ef   :  { %v4036_v18 = vpack.c.bf16 %v2851_v17, %v2849_v0  ;;  %v4050_v9 = vpack.c.bf16 %v2967_v60, %v2966_v59  ;;  %v2978_v0 = vld [vmem:[#allocation9 + $0xe0] sm:$0xff]  ;;  %v2979_v17 = vld [vmem:[#allocation9 + $0xe8] sm:$0xff] }
 0x7f0   :  { %v5214_v14 = vadd.f32 %v2655_v2, %v2654_v13  ;;  %v2950_v2 = vld [vmem:[#allocation9] sm:$0xff]  ;;  %v2951_v13 = vld [vmem:[#allocation9 + $0x8] sm:$0xff]  ;;  %v4074_v5 = vpack.c.bf16 %v2979_v17, %v2978_v0 }
 0x7f1   :  { %4051 = vmatprep.subr.bf16.mxu1 %v4050_v9 }
 0x7f2   :  { %4270 = vtanh.f32 %v5214_v14 }
 0x7fc   :  { %v4271_v29 = vpop.eup %4270 }
 0x7fd   :  { %v2658_v30 = vmul.f32 %v4271_v29, %v4269_v19  ;;  %v2968_v19 = vld [vmem:[#allocation9 + $0x90] sm:$0xff]  ;;  %v2969_v29 = vld [vmem:[#allocation9 + $0x98] sm:$0xff] }
 0x7fe   :  { %v4054_v31 = vpack.c.bf16 %v2969_v29, %v2968_v19  ;;  %v2962_v19 = vld [vmem:[#allocation9 + $0x60] sm:$0xff]  ;;  %v2963_v29 = vld [vmem:[#allocation9 + $0x68] sm:$0xff] }
 0x7ff   :  { %2728 = vmatmul.mubr.f32.vlgmr.msra.gmra.mrb[14].mxu0 %v2658_v30  ;;  %2799 = vmatmul.mubr.f32.vlgmr.msra.gmra.mrb[14].mxu1 %v2658_v30  ;;  %v4052_v30 = vpack.c.bf16 %v2951_v13, %v2950_v2 }
 0x800   :  { %2941 = vmatprep.mubr.f32.mxu0 %v4392_v1  ;;  %4021 = vmatpush1.bf16.msra.mxu0 %v4020_v20  ;;  %v2841_v1 = vld [vmem:[#allocation8 + $0x40] sm:$0xff]  ;;  %v4056_v20 = vpack.c.bf16 %v2953_v41, %v2952_v37  ;;  %v2964_v41 = vld [vmem:[#allocation9 + $0x70] sm:$0xff] }
 0x801   :  { %4023 = vmatprep.subr.bf16.mxu0 %v4022_v26  ;;  %v4028_v54 = vpack.c.bf16 %v2843_v62, %v2841_v1  ;;  %4053 = vmatpush3.bf16.msra.mxu1 %v4052_v30  ;;  %v2955_v26 = vld [vmem:[#allocation9 + $0x28] sm:$0xff]  ;;  %v2974_v1 = vld [vmem:[#allocation9 + $0xc0] sm:$0xff]  ;;  %v4076_v30 = vpack.c.bf16 %v2963_v29, %v2962_v19  ;;  %v4080_v8 = vpack.c.bf16 %v2965_v42, %v2964_v41 }
 0x802   :  { %4055 = vmatprep.subr.bf16.mxu1 %v4054_v31  ;;  %v2975_v62 = vld [vmem:[#allocation9 + $0xc8] sm:$0xff]  ;;  %v2981_v31 = vld [vmem:[#allocation9 + $0xf8] sm:$0xff] }
 0x803   :  { %v4066_v3 = vpack.c.bf16 %v2975_v62, %v2974_v1  ;;  %v3180_v62 = vld [vmem:[%s5252_s7] ss:$0 sm:$0xff] }
 0x804   :  { %4025 = vmatpush1.bf16.msra.mxu0 %v4024_v33  ;;  %v4060_v33 = vpack.c.bf16 %v2955_v26, %v2954_v25 }
 0x805   :  { %4027 = vmatprep.subr.bf16.mxu0 %v4026_v43  ;;  %4057 = vmatpush3.bf16.msra.mxu1 %v4056_v20  ;;  %v2957_v43 = vld [vmem:[#allocation9 + $0x38] sm:$0xff] }
 0x806   :  { %4059 = vmatprep.subr.bf16.mxu1 %v4058_v21  ;;  %v2865_v20 = vld [vmem:[%s5250_s5] sm:$0x3] }
 0x807   :  { %v2870_v21 = vrot.slane %v2865_v20, %v131_v45  ;;  %v2874_v25 = vrot.slane %v2865_v20, %v135_v50 }
 0x808   :  { %4029 = vmatpush1.bf16.msra.mxu0 %v4028_v54  ;;  %v4064_v54 = vpack.c.bf16 %v2957_v43, %v2956_v39 }
 0x809   :  { %4031 = vmatprep.subr.bf16.mxu0 %v4030_v56  ;;  %4061 = vmatpush3.bf16.msra.mxu1 %v4060_v33  ;;  %v2959_v56 = vld [vmem:[#allocation9 + $0x48] sm:$0xff] }
 0x80a   :  { %4063 = vmatprep.subr.bf16.mxu1 %v4062_v38 }
 0x80c   :  { %4033 = vmatpush1.bf16.msra.mxu0 %v4032_v49  ;;  %v4068_v49 = vpack.c.bf16 %v2959_v56, %v2958_v55  ;;  %v4394_v55 = vmov 0   ;;  %v3182_v56 = vld [vmem:[#allocation3] ss:$0 sm:$0xff] }
 0x80d   :  { %4035 = vmatprep.subr.bf16.mxu0 %v4034_v7  ;;  %4065 = vmatpush3.bf16.msra.mxu1 %v4064_v54  ;;  %v2961_v7 = vld [vmem:[#allocation9 + $0x58] sm:$0xff] }
 0x80e   :  { %4067 = vmatprep.subr.bf16.mxu1 %v4066_v3  ;;  %4159 = vset.pattern.permute.xlu0 %v4394_v55 }
 0x810   :  { %4037 = vmatpush1.bf16.msra.mxu0 %v4036_v18  ;;  %v4072_v18 = vpack.c.bf16 %v2961_v7, %v2960_v57 }
 0x811   :  { %4039 = vmatprep.subr.bf16.mxu0 %v4038_v11  ;;  %4069 = vmatpush3.bf16.msra.mxu1 %v4068_v49 }
 0x812   :  { %4071 = vmatprep.subr.bf16.mxu1 %v4070_v4 }
 0x814   :  { %4041 = vmatpush1.bf16.msra.mxu0 %v4040_v23 }
 0x815   :  { %4043 = vmatprep.subr.bf16.mxu0 %v4042_v35  ;;  %4073 = vmatpush3.bf16.msra.mxu1 %v4072_v18 }
 0x816   :  { %4075 = vmatprep.subr.bf16.mxu1 %v4074_v5 }
 0x818   :  { %4045 = vmatpush1.bf16.msra.mxu0 %v4044_v46 }
 0x819   :  { %4047 = vmatprep.subr.bf16.mxu0 %v4046_v47  ;;  %4077 = vmatpush3.bf16.msra.mxu1 %v4076_v30 }
 0x81c   :  { %4049 = vmatpush1.bf16.msra.mxu0 %v4048_v58 }
 0x8d2   :  { %v2729_v10 = vpop.f32.mrb[14].mxu0  ;;  %v2800_v11 = vpop.f32.mrb[14].mxu1 }
 0x8d3   :  { %v4110_v12 = vadd.f32 %v2729_v10, %v4948_v51  ;;  %v2731_v16 = vpop.f32.mrb[15].mxu0  ;;  %v2802_v22 = vpop.f32.mrb[15].mxu1  ;;  %v4112_v36 = vadd.f32 %v2800_v11, %v4961_v15 }
 0x8d4   :  { %v4111_v23 = vadd.f32 %v2731_v16, %v4952_v53  ;;  %v4113_v34 = vadd.f32 %v2802_v22, %v4957_v6 }
 0x8d5   :  { %v3177_v24 = vmul.f32 -1.442695, %v4110_v12 }
 0x8d6   :  { %v3178_v28 = vmul.f32 -1.442695, %v4111_v23  ;;  %v3179_v35 = vmul.f32 -1.442695, %v4113_v34 }
 0x8d7   :  { %4272 = vpow2.f32 %v3177_v24 }
 0x8d8   :  { %4274 = vpow2.f32 %v3178_v28 }
 0x8d9   :  { %4276 = vpow2.f32 %v3179_v35 }
 0x8da   :  { %4278 = vtanh.f32 %v4112_v36 }
 0x8e1   :  { %v4273_v40 = vpop.eup %4272 }
 0x8e2   :  { %v4275_v46 = vpop.eup %4274  ;;  %v2812_v47 = vadd.f32 1.0, %v4273_v40 }
 0x8e3   :  { %v2818_v48 = vadd.f32 1.0, %v4275_v46  ;;  %v4277_v51 = vpop.eup %4276 }
 0x8e4   :  { %4280 = vrcp.f32 %v2812_v47  ;;  %v4279_v52 = vpop.eup %4278  ;;  %v2825_v60 = vadd.f32 1.0, %v4277_v51 }
 0x8e5   :  { %4282 = vrcp.f32 %v2818_v48 }
 0x8e6   :  { %4284 = vrcp.f32 %v2825_v60 }
 0x8ee   :  { %v4281_v53 = vpop.eup %4280 }
 0x8ef   :  { %v4283_v58 = vpop.eup %4282  ;;  %v2829_v59 = vmul.f32 %v4281_v53, %v4279_v52 }
 0x8f0   :  { %v2828_v2 = vmul.f32 %v4283_v58, %v5214_v14  ;;  %v4285_v15 = vpop.eup %4284  ;;  %v2980_v14 = vld [vmem:[#allocation9 + $0xf0] sm:$0xff] }
 0x8f1   :  { %v4078_v37 = vpack.c.bf16 %v2981_v31, %v2980_v14 }
 0x8f2   :  { %v2830_v6 = vadd.f32 %v2829_v59, %v2828_v2 }
 0x8f3   :  { %4079 = vmatprep.subr.bf16.mxu1 %v4078_v37 }
 0x8f4   :  { %3085 = vst [vmem:[%s5257_s12] sm:$0xff] %v2830_v6  ;;  %4286 = vtanh.f32 %v2830_v6  ;;  %4081 = vmatpush3.bf16.msra.mxu1 %v4080_v8 }
 0x8fe   :  { %v4287_v9 = vpop.eup %4286 }
 0x8ff   :  { %v2832_v13 = vmul.f32 %v4287_v9, %v4285_v15 }
 0x901   :  { %2942 = vmatmul.mubr.f32.vlgmr.msra.gmra.mrb[16].mxu0 %v2832_v13  ;;  %3084 = vst [vmem:[%s5256_s11] sm:$0xff] %v2832_v13 }
 0x9d4   :  { %v2943_v26 = vpop.f32.mrb[16].mxu0 }
 0x9d5   :  { %v2944_v27 = vadd.f32 %v2943_v26, %v2870_v21  ;;  %v2945_v32 = vpop.f32.mrb[17].mxu0 }
 0x9d6   :  { %v2946_v33 = vadd.f32 %v2945_v32, %v2874_v25 }
 0x9d7   :  { %v2948_v39 = vmax.f32 %v2944_v27, 0.0 }
 0x9d8   :  { %v2949_v38 = vmax.f32 %v2946_v33, 0.0 }
 0x9da   :  { %3053 = vmatprep.mubr.f32.mxu1 %v2949_v38 }
 0x9db   :  { %3054 = vmatmul.mubr.f32.vlgmr.msra.gmra.mrb[16].mxu1 %v2948_v39 }
 0xaae   :  { %v3215_v43 = vpop.f32.mrb[16].mxu1 }
 0xaaf   :  { %v3216_v1 = vpop.f32.mrb[17].mxu1 }
 0xab0   :  { %v3217_v54 = vadd.f32 %v3216_v1, %v3215_v43 }
 0xab2   :  { %v3056_v3 = vadd.f32 %v3217_v54, %v3180_v62 }
 0xab4   :  { %v3059_v45 = vmax.f32 %v3056_v3, 0.0 }
 0xab6   :  { %v3067_v50 = vmul.f32 %v3181_v44, %v3059_v45 }
 0xab8   :  { %3068 = vadd.xlane.f32.xlu0 %v3067_v50 }
 0xb45   :  { %v3069_v61 = vpop.xlane.xlu0 %3068 }
 0xb46   :  { %v3077_v63 = vadd.f32 %v3182_v56, %v3069_v61 }
 0xb48   :  { %3080 = vperm.xlu0 %4159, %v3077_v63  }
 0xbc7   :  { %v3081_v49 = vpop.permute.xlu0 %3080 }
 0xbc8   :  { %3083 = vst [vmem:[%s5255_s10] sm:$0xff] %v3081_v49 }
 0xbc9   :  { %3098 = vsyncpa [#allocation5], 1 }
 0xbca   :  { %3099 = vsyncpa [#allocation7], 1 }
 0xbcb   :  { %3100 = vsyncpa [#allocation10], 1 }

</bundles_post_ra>
